<compile_context>
chip_gen: v5e
topology: v5e:2x2
jax: 0.10.0
libtpu: 0.0.40
codegen_flags: <defaults>
</compile_context>

<pallas_src>
import functools
import math

import jax
import jax.numpy as jnp
from jax.experimental import pallas as pl
from jax.experimental.pallas import tpu as pltpu

_EPS = 1e-5
_NEG_INF = -1e30


# --------------------------------------------------------------------------
# Fused decoder-layer kernel (one grid step == blockB batch elements)
# --------------------------------------------------------------------------
def _decoder_layer_kernel(*refs, nhead, eps, block_b, has_qpos, has_pos):
    f32 = jnp.float32
    bf16 = jnp.bfloat16

    refs = list(refs)
    concat_ref = refs.pop()          # scratch: (block_b*T_pad, D) bf16
    out_ref = refs.pop()
    tgt_ref, mem_ref = refs[0], refs[1]
    idx = 2
    qpos_ref = None
    pos_ref = None
    if has_qpos:
        qpos_ref = refs[idx]
        idx += 1
    if has_pos:
        pos_ref = refs[idx]
        idx += 1
    (sa_in_wT, sa_in_b, sa_out_wT, sa_out_b,
     ca_in_wT, ca_in_b, ca_out_wT, ca_out_b,
     n1g, n1b, n2g, n2b, n3g, n3b,
     l1wT, l1b, l2wT, l2b,
     self_bias_ref, cross_bias_ref) = refs[idx:]

    _, t_pad, d = tgt_ref.shape
    s_pad = mem_ref.shape[1]
    hd = d // nhead
    rows_t = block_b * t_pad
    rows_s = block_b * s_pad

    def mm(x, w_t):
        # x: (N, K) fp32; w_t: (K, M) bf16, pre-transposed/cast in the wrapper.
        return jnp.dot(x.astype(bf16), w_t, preferred_element_type=f32)

    def layernorm(x, g, b):
        mu = jnp.mean(x, axis=-1, keepdims=True)
        var = jnp.mean(jnp.square(x - mu), axis=-1, keepdims=True)
        return (x - mu) * jax.lax.rsqrt(var + eps) * g + b

    def mha(q_in, k_in, v_in, in_wT_ref, in_b_ref, out_wT_ref, out_b_ref,
            key_bias, lk):
        scale = float(hd) ** -0.5
        # Full-width (K = D) projections; q/k/v cast to bf16 ONCE (casts hoisted
        # out of the head loop).
        q = ((mm(q_in, in_wT_ref[0]) + in_b_ref[0]) * scale).astype(bf16)
        k = (mm(k_in, in_wT_ref[1]) + in_b_ref[1]).astype(bf16)
        v = (mm(v_in, in_wT_ref[2]) + in_b_ref[2]).astype(bf16)
        # Per-(batch, head) score / PV stage; head outputs land in a lane-dense
        # (rows_t, D) concat scratch so the out-projection is ONE K=D GEMM.
        # Static unroll is small (block_b * nhead); intermediates die at each
        # scratch store so live ranges stay bounded.
        for bi in range(block_b):
            qb = q[bi * t_pad:(bi + 1) * t_pad]
            kb = k[bi * lk:(bi + 1) * lk]
            vb = v[bi * lk:(bi + 1) * lk]
            for h in range(nhead):
                sl = slice(h * hd, (h + 1) * hd)
                s = jax.lax.dot_general(                      # (T_pad, lk)
                    qb[:, sl], kb[:, sl],
                    dimension_numbers=(((1,), (1,)), ((), ())),
                    preferred_element_type=f32)
                s = s + key_bias                              # mask padded keys
                s = s - jnp.max(s, axis=-1, keepdims=True)
                p = jnp.exp(s)
                p = p * pl.reciprocal(jnp.sum(p, axis=-1, keepdims=True),
                                      approx=True)
                head = jnp.dot(p.astype(bf16), vb[:, sl],
                               preferred_element_type=f32)     # (T_pad, hd)
                concat_ref[bi * t_pad:(bi + 1) * t_pad, sl] = head.astype(bf16)
        attn = jnp.dot(concat_ref[...], out_wT_ref[...],
                       preferred_element_type=f32)             # (rows_t, D)
        return attn + out_b_ref[...]

    # Residual stream stays fp32; the batch block is folded into the row dim so
    # every GEMM / LN sees a (block_b*T, D) operand (better MXU M-occupancy).
    tgt = tgt_ref[...].reshape(rows_t, d).astype(f32)
    mem = mem_ref[...].reshape(rows_s, d).astype(f32)
    qpos = (qpos_ref[...].reshape(rows_t, d).astype(f32) if has_qpos else None)
    pos = (pos_ref[...].reshape(rows_s, d).astype(f32) if has_pos else None)

    def add_pos(x, p):
        return x if p is None else x + p

    self_bias = self_bias_ref[...]
    cross_bias = cross_bias_ref[...]

    # ---- self-attention block (pre-norm); dropout1 = identity (eval) ----
    t2 = layernorm(tgt, n1g[...], n1b[...])
    qk = add_pos(t2, qpos)
    tgt = tgt + mha(qk, qk, t2, sa_in_wT, sa_in_b, sa_out_wT, sa_out_b,
                    self_bias, t_pad)

    # ---- cross-attention block (pre-norm); dropout2 = identity ----
    t2 = layernorm(tgt, n2g[...], n2b[...])
    tgt = tgt + mha(add_pos(t2, qpos), add_pos(mem, pos), mem,
                    ca_in_wT, ca_in_b, ca_out_wT, ca_out_b,
                    cross_bias, s_pad)

    # ---- FFN block (pre-norm, relu); dropout / dropout3 = identity ----
    t2 = layernorm(tgt, n3g[...], n3b[...])
    hmid = jnp.maximum(mm(t2, l1wT[...]) + l1b[...], 0.0)
    tgt = tgt + mm(hmid, l2wT[...]) + l2b[...]

    out_ref[...] = tgt.reshape(block_b, t_pad, d).astype(out_ref.dtype)


# --------------------------------------------------------------------------
# Wrapper
# --------------------------------------------------------------------------
def _round_up(x, m):
    return (x + m - 1) // m * m


def _choose_block_b(b, t_pad):
    # Stack batch elements so the GEMM M-dim approaches the MXU height, but
    # keep >= 2 grid steps when B >= 2 so both v7x TensorCores get work.
    bb = max(1, min(b, 256 // max(t_pad, 1)))
    while bb > 1 and math.ceil(b / bb) < 2:
        bb -= 1
    return bb


def decoder_layer_forward(tgt, memory, params, nhead, pos=None, query_pos=None):
    """forward_pre of the 3DETR TransformerDecoderLayer (eval mode, no masks).

    tgt: (T, B, D), memory: (S, B, D). Returns (tgt_out, None).
    """
    t, b, d = tgt.shape
    s = memory.shape[0]
    dff = params["lin1_w"].shape[0]
    assert d % nhead == 0

    f32, bf16 = jnp.float32, jnp.bfloat16

    # Lane/sublane-dense padding: queries -> multiple of 8 (sublanes), memory
    # length -> multiple of 128 (lanes); padded keys get a -inf additive bias.
    t_pad = _round_up(t, 8)
    s_pad = _round_up(s, 128)
    block_b = _choose_block_b(b, t_pad)
    n_steps = math.ceil(b / block_b)
    b_pad = n_steps * block_b

    def prep(x, length, length_pad, dtype):
        xb = jnp.transpose(x, (1, 0, 2))                       # (B, L, D)
        xb = jnp.pad(xb, ((0, b_pad - b), (0, length_pad - length), (0, 0)))
        return xb.astype(dtype)

    # Residual-stream input stays fp32; the large memory / positional slabs go
    # to bf16 (halves their per-step DMA). None pos/query_pos are elided.
    tgt_b = prep(tgt, t, t_pad, f32)
    mem_b = prep(memory, s, s_pad, bf16)
    act_args = [tgt_b, mem_b]
    has_qpos = query_pos is not None
    has_pos = pos is not None
    if has_qpos:
        act_args.append(prep(query_pos, t, t_pad, bf16))
    if has_pos:
        act_args.append(prep(pos, s, s_pad, bf16))

    # Weights: pre-transpose to (K, N) and pre-cast to bf16 ONCE here.
    def in_proj(wname, bname):
        w = params[wname]                                      # (3D, D) torch
        w_t = jnp.stack([w[i * d:(i + 1) * d, :].T for i in range(3)], 0)
        return w_t.astype(bf16), params[bname].reshape(3, 1, d).astype(f32)

    sa_in_wT, sa_in_b = in_proj("sa_in_w", "sa_in_b")
    ca_in_wT, ca_in_b = in_proj("ca_in_w", "ca_in_b")

    weight_args = [
        sa_in_wT, sa_in_b,
        params["sa_out_w"].T.astype(bf16),
        params["sa_out_b"].reshape(1, d).astype(f32),
        ca_in_wT, ca_in_b,
        params["ca_out_w"].T.astype(bf16),
        params["ca_out_b"].reshape(1, d).astype(f32),
        params["norm1_g"].reshape(1, d), params["norm1_b"].reshape(1, d),
        params["norm2_g"].reshape(1, d), params["norm2_b"].reshape(1, d),
        params["norm3_g"].reshape(1, d), params["norm3_b"].reshape(1, d),
        params["lin1_w"].T.astype(bf16),
        params["lin1_b"].reshape(1, dff).astype(f32),
        params["lin2_w"].T.astype(bf16),
        params["lin2_b"].reshape(1, d).astype(f32),
        # Additive key masks (0 = keep, -inf-ish = padded key position).
        jnp.where(jnp.arange(t_pad) < t, 0.0, _NEG_INF).astype(f32).reshape(1, t_pad),
        jnp.where(jnp.arange(s_pad) < s, 0.0, _NEG_INF).astype(f32).reshape(1, s_pad),
    ]
    args = act_args + weight_args

    def batched_spec(tail):
        return pl.BlockSpec((block_b,) + tail, lambda i: (i, 0, 0))

    def full_spec(a):
        nd = a.ndim
        return pl.BlockSpec(a.shape, lambda i, _z=(0,) * nd: _z)

    in_specs = ([batched_spec((t_pad, d)), batched_spec((s_pad, d))]
                + ([batched_spec((t_pad, d))] if has_qpos else [])
                + ([batched_spec((s_pad, d))] if has_pos else [])
                + [full_spec(a) for a in weight_args])

    # Explicit VMEM budget: 2x (double-buffered) activation blocks & weights,
    # scratch, rough fp32 intermediates; capped under v7x's 64 MiB physical.
    def nbytes(a):
        return int(a.size) * a.dtype.itemsize

    rows_t, rows_s = block_b * t_pad, block_b * s_pad
    blk_bytes = sum(nbytes(a) // n_steps for a in act_args)
    out_blk_bytes = rows_t * d * 4
    w_bytes = sum(nbytes(a) for a in weight_args)
    scratch_bytes = rows_t * d * 2
    inter_bytes = 4 * (10 * rows_t * max(d, dff)
                       + 8 * rows_s * d
                       + 2 * nhead * rows_t * s_pad)
    est = 2 * (blk_bytes + out_blk_bytes) + 2 * w_bytes + scratch_bytes + inter_bytes
    vmem_limit = int(min(64 * 2 ** 20, max(32 * 2 ** 20, 2 * est)))

    kern = functools.partial(_decoder_layer_kernel, nhead=nhead, eps=_EPS,
                             block_b=block_b, has_qpos=has_qpos,
                             has_pos=has_pos)

    out_b = pl.pallas_call(
        kern,
        grid=(n_steps,),
        in_specs=in_specs,
        out_specs=pl.BlockSpec((block_b, t_pad, d), lambda i: (i, 0, 0)),
        out_shape=jax.ShapeDtypeStruct((b_pad, t_pad, d), tgt.dtype),
        scratch_shapes=[pltpu.VMEM((rows_t, d), jnp.bfloat16)],
        compiler_params=pltpu.CompilerParams(
            dimension_semantics=("parallel",),
            vmem_limit_bytes=vmem_limit),
    )(*args)

    out = jnp.transpose(out_b[:b, :t, :], (1, 0, 2))
    return out, None


# --------------------------------------------------------------------------
# Pure-JAX reference (fp32, HIGHEST precision) for correctness check
# --------------------------------------------------------------------------
def _reference_forward(tgt, memory, params, nhead, pos, query_pos):
    hp = jax.lax.Precision.HIGHEST

    def ln(x, g, bta):
        mu = jnp.mean(x, -1, keepdims=True)
        var = jnp.mean((x - mu) ** 2, -1, keepdims=True)
        return (x - mu) * jax.lax.rsqrt(var + _EPS) * g + bta

    def mha(q_in, k_in, v_in, in_w, in_b, out_w, out_b):
        L, B, D = q_in.shape
        S = k_in.shape[0]
        hd = D // nhead
        wq, wk, wv = jnp.split(in_w, 3, axis=0)
        bq, bk, bv = jnp.split(in_b, 3, axis=0)
        q = (jnp.einsum("lbd,ed->lbe", q_in, wq, precision=hp) + bq) * (hd ** -0.5)
        k = jnp.einsum("sbd,ed->sbe", k_in, wk, precision=hp) + bk
        v = jnp.einsum("sbd,ed->sbe", v_in, wv, precision=hp) + bv
        q = q.reshape(L, B, nhead, hd)
        k = k.reshape(S, B, nhead, hd)
        v = v.reshape(S, B, nhead, hd)
        logits = jnp.einsum("lbhd,sbhd->bhls", q, k, precision=hp)
        p = jax.nn.softmax(logits, axis=-1)
        o = jnp.einsum("bhls,sbhd->lbhd", p, v, precision=hp).reshape(L, B, D)
        return jnp.einsum("lbd,ed->lbe", o, out_w, precision=hp) + out_b

    def wp(x, p_):
        return x if p_ is None else x + p_

    x = tgt
    t2 = ln(x, params["norm1_g"], params["norm1_b"])
    qk = wp(t2, query_pos)
    x = x + mha(qk, qk, t2, params["sa_in_w"], params["sa_in_b"],
                params["sa_out_w"], params["sa_out_b"])
    t2 = ln(x, params["norm2_g"], params["norm2_b"])
    x = x + mha(wp(t2, query_pos), wp(memory, pos), memory,
                params["ca_in_w"], params["ca_in_b"],
                params["ca_out_w"], params["ca_out_b"])
    t2 = ln(x, params["norm3_g"], params["norm3_b"])
    h = jax.nn.relu(jnp.einsum("lbd,fd->lbf", t2, params["lin1_w"],
                               precision=hp) + params["lin1_b"])
    x = x + jnp.einsum("lbf,df->lbd", h, params["lin2_w"],
                       precision=hp) + params["lin2_b"]
    return x


# --------------------------------------------------------------------------
# Deterministic parameter init (torch layouts / shapes)
# --------------------------------------------------------------------------
def init_params(key, d_model, nhead, dim_feedforward):
    keys = jax.random.split(key, 12)

    def w(k, shape, scale=0.05):
        return jax.random.normal(k, shape, dtype=jnp.float32) * scale

    return {
        "sa_in_w": w(keys[0], (3 * d_model, d_model)),
        "sa_in_b": w(keys[1], (3 * d_model,), 0.01),
        "sa_out_w": w(keys[2], (d_model, d_model)),
        "sa_out_b": w(keys[3], (d_model,), 0.01),
        "ca_in_w": w(keys[4], (3 * d_model, d_model)),
        "ca_in_b": w(keys[5], (3 * d_model,), 0.01),
        "ca_out_w": w(keys[6], (d_model, d_model)),
        "ca_out_b": w(keys[7], (d_model,), 0.01),
        "norm1_g": jnp.ones((d_model,), jnp.float32),
        "norm1_b": jnp.zeros((d_model,), jnp.float32),
        "norm2_g": jnp.ones((d_model,), jnp.float32),
        "norm2_b": jnp.zeros((d_model,), jnp.float32),
        "norm3_g": jnp.ones((d_model,), jnp.float32),
        "norm3_b": jnp.zeros((d_model,), jnp.float32),
        "lin1_w": w(keys[8], (dim_feedforward, d_model)),
        "lin1_b": w(keys[9], (dim_feedforward,), 0.01),
        "lin2_w": w(keys[10], (d_model, dim_feedforward)),
        "lin2_b": w(keys[11], (d_model,), 0.01),
    }


# --------------------------------------------------------------------------
if __name__ == "__main__":
    d_model = 128                 # lane-dense last dim (3DETR uses 256)
    nhead = 4
    dim_feedforward = 256
    T, S, B = 8, 16, 2            # num queries, memory length, batch

    root = jax.random.PRNGKey(0)
    k_tgt, k_mem, k_pos, k_qpos, k_par = jax.random.split(root, 5)

    tgt = jax.random.normal(k_tgt, (T, B, d_model), dtype=jnp.float32)
    memory = jax.random.normal(k_mem, (S, B, d_model), dtype=jnp.float32)
    pos = jax.random.normal(k_pos, (S, B, d_model), dtype=jnp.float32)
    query_pos = jax.random.normal(k_qpos, (T, B, d_model), dtype=jnp.float32)

    params = init_params(k_par, d_model, nhead, dim_feedforward)

    fwd = jax.jit(functools.partial(decoder_layer_forward, nhead=nhead))
    out, attn = fwd(tgt, memory, params, pos=pos, query_pos=query_pos)
    out = jax.block_until_ready(out)

    assert out.shape == (T, B, d_model)
    assert bool(jnp.all(jnp.isfinite(out)))
    assert attn is None

    # Reference sees the same bf16-quantized memory / pos / query_pos the
    # kernel wrapper ships, so the comparison isolates matmul-precision error.
    def q16(x):
        return None if x is None else x.astype(jnp.bfloat16).astype(jnp.float32)

    ref = _reference_forward(tgt, q16(memory), params, nhead,
                             q16(pos), q16(query_pos))
    max_err = float(jnp.max(jnp.abs(out - ref)))
    assert max_err < 5e-2, f"max abs error vs reference = {max_err}"

    print("KERNEL_OK")
</pallas_src>

<mosaic_0001>
module attributes {stable_mosaic.version = 11 : i64} {
  func.func @_decoder_layer_kernel(%arg0: i32, %arg1: memref<1x8x128xf32, #tpu.memory_space<vmem>>, %arg2: memref<1x128x128xbf16, #tpu.memory_space<vmem>>, %arg3: memref<1x8x128xbf16, #tpu.memory_space<vmem>>, %arg4: memref<1x128x128xbf16, #tpu.memory_space<vmem>>, %arg5: memref<3x128x128xbf16, #tpu.memory_space<vmem>>, %arg6: memref<3x1x128xf32, #tpu.memory_space<vmem>>, %arg7: memref<128x128xbf16, #tpu.memory_space<vmem>>, %arg8: memref<1x128xf32, #tpu.memory_space<vmem>>, %arg9: memref<3x128x128xbf16, #tpu.memory_space<vmem>>, %arg10: memref<3x1x128xf32, #tpu.memory_space<vmem>>, %arg11: memref<128x128xbf16, #tpu.memory_space<vmem>>, %arg12: memref<1x128xf32, #tpu.memory_space<vmem>>, %arg13: memref<1x128xf32, #tpu.memory_space<vmem>>, %arg14: memref<1x128xf32, #tpu.memory_space<vmem>>, %arg15: memref<1x128xf32, #tpu.memory_space<vmem>>, %arg16: memref<1x128xf32, #tpu.memory_space<vmem>>, %arg17: memref<1x128xf32, #tpu.memory_space<vmem>>, %arg18: memref<1x128xf32, #tpu.memory_space<vmem>>, %arg19: memref<128x256xbf16, #tpu.memory_space<vmem>>, %arg20: memref<1x256xf32, #tpu.memory_space<vmem>>, %arg21: memref<256x128xbf16, #tpu.memory_space<vmem>>, %arg22: memref<1x128xf32, #tpu.memory_space<vmem>>, %arg23: memref<1x8xf32, #tpu.memory_space<vmem>>, %arg24: memref<1x128xf32, #tpu.memory_space<vmem>>, %arg25: memref<1x8x128xf32, #tpu.memory_space<vmem>>, %arg26: memref<8x128xbf16, #tpu.memory_space<vmem>>) attributes {dimension_semantics = [#tpu.dimension_semantics<parallel>], iteration_bounds = array<i64: 2>, scalar_prefetch = 0 : i64, scratch_operands = 1 : i64, tpu.core_type = #tpu.core_type<tc>, window_params = [{transform_indices = @transform_0, window_bounds = array<i64: 1, 8, 128>}, {transform_indices = @transform_1, window_bounds = array<i64: 1, 128, 128>}, {transform_indices = @transform_2, window_bounds = array<i64: 1, 8, 128>}, {transform_indices = @transform_3, window_bounds = array<i64: 1, 128, 128>}, {pipeline_mode = #tpu.pipeline_mode<synchronous>, transform_indices = @transform_4, window_bounds = array<i64: 3, 128, 128>}, {pipeline_mode = #tpu.pipeline_mode<synchronous>, transform_indices = @transform_5, window_bounds = array<i64: 3, 1, 128>}, {pipeline_mode = #tpu.pipeline_mode<synchronous>, transform_indices = @transform_6, window_bounds = array<i64: 128, 128>}, {pipeline_mode = #tpu.pipeline_mode<synchronous>, transform_indices = @transform_7, window_bounds = array<i64: 1, 128>}, {pipeline_mode = #tpu.pipeline_mode<synchronous>, transform_indices = @transform_8, window_bounds = array<i64: 3, 128, 128>}, {pipeline_mode = #tpu.pipeline_mode<synchronous>, transform_indices = @transform_9, window_bounds = array<i64: 3, 1, 128>}, {pipeline_mode = #tpu.pipeline_mode<synchronous>, transform_indices = @transform_10, window_bounds = array<i64: 128, 128>}, {pipeline_mode = #tpu.pipeline_mode<synchronous>, transform_indices = @transform_11, window_bounds = array<i64: 1, 128>}, {pipeline_mode = #tpu.pipeline_mode<synchronous>, transform_indices = @transform_12, window_bounds = array<i64: 1, 128>}, {pipeline_mode = #tpu.pipeline_mode<synchronous>, transform_indices = @transform_13, window_bounds = array<i64: 1, 128>}, {pipeline_mode = #tpu.pipeline_mode<synchronous>, transform_indices = @transform_14, window_bounds = array<i64: 1, 128>}, {pipeline_mode = #tpu.pipeline_mode<synchronous>, transform_indices = @transform_15, window_bounds = array<i64: 1, 128>}, {pipeline_mode = #tpu.pipeline_mode<synchronous>, transform_indices = @transform_16, window_bounds = array<i64: 1, 128>}, {pipeline_mode = #tpu.pipeline_mode<synchronous>, transform_indices = @transform_17, window_bounds = array<i64: 1, 128>}, {pipeline_mode = #tpu.pipeline_mode<synchronous>, transform_indices = @transform_18, window_bounds = array<i64: 128, 256>}, {pipeline_mode = #tpu.pipeline_mode<synchronous>, transform_indices = @transform_19, window_bounds = array<i64: 1, 256>}, {pipeline_mode = #tpu.pipeline_mode<synchronous>, transform_indices = @transform_20, window_bounds = array<i64: 256, 128>}, {pipeline_mode = #tpu.pipeline_mode<synchronous>, transform_indices = @transform_21, window_bounds = array<i64: 1, 128>}, {pipeline_mode = #tpu.pipeline_mode<synchronous>, transform_indices = @transform_22, window_bounds = array<i64: 1, 8>}, {pipeline_mode = #tpu.pipeline_mode<synchronous>, transform_indices = @transform_23, window_bounds = array<i64: 1, 128>}, {transform_indices = @transform_24, window_bounds = array<i64: 1, 8, 128>}]} {
    %c0 = arith.constant 0 : index
    %c0_0 = arith.constant 0 : index
    %c0_1 = arith.constant 0 : index
    %0 = vector.load %arg1[%c0, %c0_0, %c0_1] : memref<1x8x128xf32, #tpu.memory_space<vmem>>, vector<1x8x128xf32>
    %1 = vector.shape_cast %0 : vector<1x8x128xf32> to vector<8x128xf32>
    %c0_2 = arith.constant 0 : index
    %c0_3 = arith.constant 0 : index
    %c0_4 = arith.constant 0 : index
    %2 = vector.load %arg2[%c0_2, %c0_3, %c0_4] : memref<1x128x128xbf16, #tpu.memory_space<vmem>>, vector<1x128x128xbf16>
    %3 = vector.shape_cast %2 : vector<1x128x128xbf16> to vector<128x128xbf16>
    %4 = arith.extf %3 : vector<128x128xbf16> to vector<128x128xf32>
    %c0_5 = arith.constant 0 : index
    %c0_6 = arith.constant 0 : index
    %c0_7 = arith.constant 0 : index
    %5 = vector.load %arg3[%c0_5, %c0_6, %c0_7] : memref<1x8x128xbf16, #tpu.memory_space<vmem>>, vector<1x8x128xbf16>
    %6 = vector.shape_cast %5 : vector<1x8x128xbf16> to vector<8x128xbf16>
    %7 = arith.extf %6 : vector<8x128xbf16> to vector<8x128xf32>
    %c0_8 = arith.constant 0 : index
    %c0_9 = arith.constant 0 : index
    %c0_10 = arith.constant 0 : index
    %8 = vector.load %arg4[%c0_8, %c0_9, %c0_10] : memref<1x128x128xbf16, #tpu.memory_space<vmem>>, vector<1x128x128xbf16>
    %9 = vector.shape_cast %8 : vector<1x128x128xbf16> to vector<128x128xbf16>
    %10 = arith.extf %9 : vector<128x128xbf16> to vector<128x128xf32>
    %c0_11 = arith.constant 0 : index
    %c0_12 = arith.constant 0 : index
    %11 = vector.load %arg23[%c0_11, %c0_12] : memref<1x8xf32, #tpu.memory_space<vmem>>, vector<1x8xf32>
    %c0_13 = arith.constant 0 : index
    %c0_14 = arith.constant 0 : index
    %12 = vector.load %arg24[%c0_13, %c0_14] : memref<1x128xf32, #tpu.memory_space<vmem>>, vector<1x128xf32>
    %c0_15 = arith.constant 0 : index
    %c0_16 = arith.constant 0 : index
    %13 = vector.load %arg13[%c0_15, %c0_16] : memref<1x128xf32, #tpu.memory_space<vmem>>, vector<1x128xf32>
    %c0_17 = arith.constant 0 : index
    %c0_18 = arith.constant 0 : index
    %14 = vector.load %arg14[%c0_17, %c0_18] : memref<1x128xf32, #tpu.memory_space<vmem>>, vector<1x128xf32>
    %cst = arith.constant dense<0.000000e+00> : vector<8xf32>
    %15 = vector.multi_reduction <add>, %1, %cst [1] : vector<8x128xf32> to vector<8xf32>
    %16 = vector.shape_cast %15 : vector<8xf32> to vector<8x1xf32>
    %cst_19 = arith.constant 1.280000e+02 : f32
    %17 = vector.broadcast %cst_19 : f32 to vector<8x1xf32>
    %18 = arith.divf %16, %17 : vector<8x1xf32>
    %19 = vector.broadcast %18 : vector<8x1xf32> to vector<8x128xf32>
    %20 = arith.subf %1, %19 : vector<8x128xf32>
    %21 = arith.mulf %20, %20 : vector<8x128xf32>
    %cst_20 = arith.constant dense<0.000000e+00> : vector<8xf32>
    %22 = vector.multi_reduction <add>, %21, %cst_20 [1] : vector<8x128xf32> to vector<8xf32>
    %23 = vector.shape_cast %22 : vector<8xf32> to vector<8x1xf32>
    %cst_21 = arith.constant 1.280000e+02 : f32
    %24 = vector.broadcast %cst_21 : f32 to vector<8x1xf32>
    %25 = arith.divf %23, %24 : vector<8x1xf32>
    %26 = vector.broadcast %18 : vector<8x1xf32> to vector<8x128xf32>
    %27 = arith.subf %1, %26 : vector<8x128xf32>
    %cst_22 = arith.constant 9.99999974E-6 : f32
    %28 = vector.broadcast %cst_22 : f32 to vector<8x1xf32>
    %29 = arith.addf %25, %28 : vector<8x1xf32>
    %30 = math.rsqrt %29 : vector<8x1xf32>
    %31 = vector.broadcast %30 : vector<8x1xf32> to vector<8x128xf32>
    %32 = arith.mulf %27, %31 : vector<8x128xf32>
    %33 = vector.broadcast %13 : vector<1x128xf32> to vector<8x128xf32>
    %34 = arith.mulf %32, %33 : vector<8x128xf32>
    %35 = vector.broadcast %14 : vector<1x128xf32> to vector<8x128xf32>
    %36 = arith.addf %34, %35 : vector<8x128xf32>
    %37 = arith.addf %36, %7 : vector<8x128xf32>
    %c0_23 = arith.constant 0 : index
    %c0_24 = arith.constant 0 : index
    %c0_25 = arith.constant 0 : index
    %38 = vector.load %arg5[%c0_23, %c0_24, %c0_25] : memref<3x128x128xbf16, #tpu.memory_space<vmem>>, vector<1x128x128xbf16>
    %39 = vector.shape_cast %38 : vector<1x128x128xbf16> to vector<128x128xbf16>
    %40 = arith.truncf %37 : vector<8x128xf32> to vector<8x128xbf16>
    %cst_26 = arith.constant dense<0.000000e+00> : vector<8x128xf32>
    %41 = tpu.matmul %40, %39, %cst_26 {dimension_numbers = #tpu.dot_dimension_numbers<[1], [0], [0], [1], [0, 0, 1, 1], [], []>} : vector<8x128xbf16>, vector<128x128xbf16>, vector<8x128xf32> -> vector<8x128xf32>
    %c0_27 = arith.constant 0 : index
    %c0_28 = arith.constant 0 : index
    %c0_29 = arith.constant 0 : index
    %42 = vector.load %arg6[%c0_27, %c0_28, %c0_29] : memref<3x1x128xf32, #tpu.memory_space<vmem>>, vector<1x1x128xf32>
    %43 = vector.shape_cast %42 : vector<1x1x128xf32> to vector<1x128xf32>
    %44 = vector.broadcast %43 : vector<1x128xf32> to vector<8x128xf32>
    %45 = arith.addf %41, %44 : vector<8x128xf32>
    %cst_30 = arith.constant 0.176776692 : f32
    %46 = vector.broadcast %cst_30 : f32 to vector<8x128xf32>
    %47 = arith.mulf %45, %46 : vector<8x128xf32>
    %48 = arith.truncf %47 : vector<8x128xf32> to vector<8x128xbf16>
    %c1 = arith.constant 1 : index
    %c0_31 = arith.constant 0 : index
    %c0_32 = arith.constant 0 : index
    %49 = vector.load %arg5[%c1, %c0_31, %c0_32] : memref<3x128x128xbf16, #tpu.memory_space<vmem>>, vector<1x128x128xbf16>
    %50 = vector.shape_cast %49 : vector<1x128x128xbf16> to vector<128x128xbf16>
    %51 = arith.truncf %37 : vector<8x128xf32> to vector<8x128xbf16>
    %cst_33 = arith.constant dense<0.000000e+00> : vector<8x128xf32>
    %52 = tpu.matmul %51, %50, %cst_33 {dimension_numbers = #tpu.dot_dimension_numbers<[1], [0], [0], [1], [0, 0, 1, 1], [], []>} : vector<8x128xbf16>, vector<128x128xbf16>, vector<8x128xf32> -> vector<8x128xf32>
    %c1_34 = arith.constant 1 : index
    %c0_35 = arith.constant 0 : index
    %c0_36 = arith.constant 0 : index
    %53 = vector.load %arg6[%c1_34, %c0_35, %c0_36] : memref<3x1x128xf32, #tpu.memory_space<vmem>>, vector<1x1x128xf32>
    %54 = vector.shape_cast %53 : vector<1x1x128xf32> to vector<1x128xf32>
    %55 = vector.broadcast %54 : vector<1x128xf32> to vector<8x128xf32>
    %56 = arith.addf %52, %55 : vector<8x128xf32>
    %57 = arith.truncf %56 : vector<8x128xf32> to vector<8x128xbf16>
    %c2 = arith.constant 2 : index
    %c0_37 = arith.constant 0 : index
    %c0_38 = arith.constant 0 : index
    %58 = vector.load %arg5[%c2, %c0_37, %c0_38] : memref<3x128x128xbf16, #tpu.memory_space<vmem>>, vector<1x128x128xbf16>
    %59 = vector.shape_cast %58 : vector<1x128x128xbf16> to vector<128x128xbf16>
    %60 = arith.truncf %36 : vector<8x128xf32> to vector<8x128xbf16>
    %cst_39 = arith.constant dense<0.000000e+00> : vector<8x128xf32>
    %61 = tpu.matmul %60, %59, %cst_39 {dimension_numbers = #tpu.dot_dimension_numbers<[1], [0], [0], [1], [0, 0, 1, 1], [], []>} : vector<8x128xbf16>, vector<128x128xbf16>, vector<8x128xf32> -> vector<8x128xf32>
    %c2_40 = arith.constant 2 : index
    %c0_41 = arith.constant 0 : index
    %c0_42 = arith.constant 0 : index
    %62 = vector.load %arg6[%c2_40, %c0_41, %c0_42] : memref<3x1x128xf32, #tpu.memory_space<vmem>>, vector<1x1x128xf32>
    %63 = vector.shape_cast %62 : vector<1x1x128xf32> to vector<1x128xf32>
    %64 = vector.broadcast %63 : vector<1x128xf32> to vector<8x128xf32>
    %65 = arith.addf %61, %64 : vector<8x128xf32>
    %66 = arith.truncf %65 : vector<8x128xf32> to vector<8x128xbf16>
    %67 = vector.extract_strided_slice %48 {offsets = [0, 0], sizes = [8, 32], strides = [1, 1]} : vector<8x128xbf16> to vector<8x32xbf16>
    %68 = vector.extract_strided_slice %57 {offsets = [0, 0], sizes = [8, 32], strides = [1, 1]} : vector<8x128xbf16> to vector<8x32xbf16>
    %cst_43 = arith.constant dense<0.000000e+00> : vector<8x8xf32>
    %69 = tpu.matmul %67, %68, %cst_43 {dimension_numbers = #tpu.dot_dimension_numbers<[1], [1], [0], [0], [0, 0, 1, 0], [], []>} : vector<8x32xbf16>, vector<8x32xbf16>, vector<8x8xf32> -> vector<8x8xf32>
    %70 = vector.broadcast %11 : vector<1x8xf32> to vector<8x8xf32>
    %71 = arith.addf %69, %70 : vector<8x8xf32>
    %cst_44 = arith.constant dense<0xFF800000> : vector<8xf32>
    %72 = vector.multi_reduction <maximumf>, %71, %cst_44 [1] : vector<8x8xf32> to vector<8xf32>
    %73 = vector.shape_cast %72 : vector<8xf32> to vector<8x1xf32>
    %74 = vector.broadcast %73 : vector<8x1xf32> to vector<8x8xf32>
    %75 = arith.subf %71, %74 : vector<8x8xf32>
    %76 = math.exp %75 : vector<8x8xf32>
    %cst_45 = arith.constant dense<0.000000e+00> : vector<8xf32>
    %77 = vector.multi_reduction <add>, %76, %cst_45 [1] : vector<8x8xf32> to vector<8xf32>
    %78 = vector.shape_cast %77 : vector<8xf32> to vector<8x1xf32>
    %79 = tpu.reciprocal %78 {approx = true} : vector<8x1xf32> -> vector<8x1xf32>
    %80 = vector.broadcast %79 : vector<8x1xf32> to vector<8x8xf32>
    %81 = arith.mulf %76, %80 : vector<8x8xf32>
    %82 = arith.truncf %81 : vector<8x8xf32> to vector<8x8xbf16>
    %83 = vector.extract_strided_slice %66 {offsets = [0, 0], sizes = [8, 32], strides = [1, 1]} : vector<8x128xbf16> to vector<8x32xbf16>
    %cst_46 = arith.constant dense<0.000000e+00> : vector<8x32xf32>
    %84 = tpu.matmul %82, %83, %cst_46 {dimension_numbers = #tpu.dot_dimension_numbers<[1], [0], [0], [1], [0, 0, 1, 1], [], []>} : vector<8x8xbf16>, vector<8x32xbf16>, vector<8x32xf32> -> vector<8x32xf32>
    %85 = arith.truncf %84 : vector<8x32xf32> to vector<8x32xbf16>
    %c0_47 = arith.constant 0 : index
    %c0_48 = arith.constant 0 : index
    %86 = vector.load %arg26[%c0_47, %c0_48] : memref<8x128xbf16, #tpu.memory_space<vmem>>, vector<8x32xbf16>
    tpu.vector_store %arg26[%c0_47, %c0_48], %85 {strides = array<i32>} : memref<8x128xbf16, #tpu.memory_space<vmem>>, vector<8x32xbf16>,
    %87 = vector.extract_strided_slice %48 {offsets = [0, 32], sizes = [8, 32], strides = [1, 1]} : vector<8x128xbf16> to vector<8x32xbf16>
    %88 = vector.extract_strided_slice %57 {offsets = [0, 32], sizes = [8, 32], strides = [1, 1]} : vector<8x128xbf16> to vector<8x32xbf16>
    %cst_49 = arith.constant dense<0.000000e+00> : vector<8x8xf32>
    %89 = tpu.matmul %87, %88, %cst_49 {dimension_numbers = #tpu.dot_dimension_numbers<[1], [1], [0], [0], [0, 0, 1, 0], [], []>} : vector<8x32xbf16>, vector<8x32xbf16>, vector<8x8xf32> -> vector<8x8xf32>
    %90 = vector.broadcast %11 : vector<1x8xf32> to vector<8x8xf32>
    %91 = arith.addf %89, %90 : vector<8x8xf32>
    %cst_50 = arith.constant dense<0xFF800000> : vector<8xf32>
    %92 = vector.multi_reduction <maximumf>, %91, %cst_50 [1] : vector<8x8xf32> to vector<8xf32>
    %93 = vector.shape_cast %92 : vector<8xf32> to vector<8x1xf32>
    %94 = vector.broadcast %93 : vector<8x1xf32> to vector<8x8xf32>
    %95 = arith.subf %91, %94 : vector<8x8xf32>
    %96 = math.exp %95 : vector<8x8xf32>
    %cst_51 = arith.constant dense<0.000000e+00> : vector<8xf32>
    %97 = vector.multi_reduction <add>, %96, %cst_51 [1] : vector<8x8xf32> to vector<8xf32>
    %98 = vector.shape_cast %97 : vector<8xf32> to vector<8x1xf32>
    %99 = tpu.reciprocal %98 {approx = true} : vector<8x1xf32> -> vector<8x1xf32>
    %100 = vector.broadcast %99 : vector<8x1xf32> to vector<8x8xf32>
    %101 = arith.mulf %96, %100 : vector<8x8xf32>
    %102 = arith.truncf %101 : vector<8x8xf32> to vector<8x8xbf16>
    %103 = vector.extract_strided_slice %66 {offsets = [0, 32], sizes = [8, 32], strides = [1, 1]} : vector<8x128xbf16> to vector<8x32xbf16>
    %cst_52 = arith.constant dense<0.000000e+00> : vector<8x32xf32>
    %104 = tpu.matmul %102, %103, %cst_52 {dimension_numbers = #tpu.dot_dimension_numbers<[1], [0], [0], [1], [0, 0, 1, 1], [], []>} : vector<8x8xbf16>, vector<8x32xbf16>, vector<8x32xf32> -> vector<8x32xf32>
    %105 = arith.truncf %104 : vector<8x32xf32> to vector<8x32xbf16>
    %c0_53 = arith.constant 0 : index
    %c32 = arith.constant 32 : index
    %106 = vector.load %arg26[%c0_53, %c32] : memref<8x128xbf16, #tpu.memory_space<vmem>>, vector<8x32xbf16>
    tpu.vector_store %arg26[%c0_53, %c32], %105 {strides = array<i32>} : memref<8x128xbf16, #tpu.memory_space<vmem>>, vector<8x32xbf16>,
    %107 = vector.extract_strided_slice %48 {offsets = [0, 64], sizes = [8, 32], strides = [1, 1]} : vector<8x128xbf16> to vector<8x32xbf16>
    %108 = vector.extract_strided_slice %57 {offsets = [0, 64], sizes = [8, 32], strides = [1, 1]} : vector<8x128xbf16> to vector<8x32xbf16>
    %cst_54 = arith.constant dense<0.000000e+00> : vector<8x8xf32>
    %109 = tpu.matmul %107, %108, %cst_54 {dimension_numbers = #tpu.dot_dimension_numbers<[1], [1], [0], [0], [0, 0, 1, 0], [], []>} : vector<8x32xbf16>, vector<8x32xbf16>, vector<8x8xf32> -> vector<8x8xf32>
    %110 = vector.broadcast %11 : vector<1x8xf32> to vector<8x8xf32>
    %111 = arith.addf %109, %110 : vector<8x8xf32>
    %cst_55 = arith.constant dense<0xFF800000> : vector<8xf32>
    %112 = vector.multi_reduction <maximumf>, %111, %cst_55 [1] : vector<8x8xf32> to vector<8xf32>
    %113 = vector.shape_cast %112 : vector<8xf32> to vector<8x1xf32>
    %114 = vector.broadcast %113 : vector<8x1xf32> to vector<8x8xf32>
    %115 = arith.subf %111, %114 : vector<8x8xf32>
    %116 = math.exp %115 : vector<8x8xf32>
    %cst_56 = arith.constant dense<0.000000e+00> : vector<8xf32>
    %117 = vector.multi_reduction <add>, %116, %cst_56 [1] : vector<8x8xf32> to vector<8xf32>
    %118 = vector.shape_cast %117 : vector<8xf32> to vector<8x1xf32>
    %119 = tpu.reciprocal %118 {approx = true} : vector<8x1xf32> -> vector<8x1xf32>
    %120 = vector.broadcast %119 : vector<8x1xf32> to vector<8x8xf32>
    %121 = arith.mulf %116, %120 : vector<8x8xf32>
    %122 = arith.truncf %121 : vector<8x8xf32> to vector<8x8xbf16>
    %123 = vector.extract_strided_slice %66 {offsets = [0, 64], sizes = [8, 32], strides = [1, 1]} : vector<8x128xbf16> to vector<8x32xbf16>
    %cst_57 = arith.constant dense<0.000000e+00> : vector<8x32xf32>
    %124 = tpu.matmul %122, %123, %cst_57 {dimension_numbers = #tpu.dot_dimension_numbers<[1], [0], [0], [1], [0, 0, 1, 1], [], []>} : vector<8x8xbf16>, vector<8x32xbf16>, vector<8x32xf32> -> vector<8x32xf32>
    %125 = arith.truncf %124 : vector<8x32xf32> to vector<8x32xbf16>
    %c0_58 = arith.constant 0 : index
    %c64 = arith.constant 64 : index
    %126 = vector.load %arg26[%c0_58, %c64] : memref<8x128xbf16, #tpu.memory_space<vmem>>, vector<8x32xbf16>
    tpu.vector_store %arg26[%c0_58, %c64], %125 {strides = array<i32>} : memref<8x128xbf16, #tpu.memory_space<vmem>>, vector<8x32xbf16>,
    %127 = vector.extract_strided_slice %48 {offsets = [0, 96], sizes = [8, 32], strides = [1, 1]} : vector<8x128xbf16> to vector<8x32xbf16>
    %128 = vector.extract_strided_slice %57 {offsets = [0, 96], sizes = [8, 32], strides = [1, 1]} : vector<8x128xbf16> to vector<8x32xbf16>
    %cst_59 = arith.constant dense<0.000000e+00> : vector<8x8xf32>
    %129 = tpu.matmul %127, %128, %cst_59 {dimension_numbers = #tpu.dot_dimension_numbers<[1], [1], [0], [0], [0, 0, 1, 0], [], []>} : vector<8x32xbf16>, vector<8x32xbf16>, vector<8x8xf32> -> vector<8x8xf32>
    %130 = vector.broadcast %11 : vector<1x8xf32> to vector<8x8xf32>
    %131 = arith.addf %129, %130 : vector<8x8xf32>
    %cst_60 = arith.constant dense<0xFF800000> : vector<8xf32>
    %132 = vector.multi_reduction <maximumf>, %131, %cst_60 [1] : vector<8x8xf32> to vector<8xf32>
    %133 = vector.shape_cast %132 : vector<8xf32> to vector<8x1xf32>
    %134 = vector.broadcast %133 : vector<8x1xf32> to vector<8x8xf32>
    %135 = arith.subf %131, %134 : vector<8x8xf32>
    %136 = math.exp %135 : vector<8x8xf32>
    %cst_61 = arith.constant dense<0.000000e+00> : vector<8xf32>
    %137 = vector.multi_reduction <add>, %136, %cst_61 [1] : vector<8x8xf32> to vector<8xf32>
    %138 = vector.shape_cast %137 : vector<8xf32> to vector<8x1xf32>
    %139 = tpu.reciprocal %138 {approx = true} : vector<8x1xf32> -> vector<8x1xf32>
    %140 = vector.broadcast %139 : vector<8x1xf32> to vector<8x8xf32>
    %141 = arith.mulf %136, %140 : vector<8x8xf32>
    %142 = arith.truncf %141 : vector<8x8xf32> to vector<8x8xbf16>
    %143 = vector.extract_strided_slice %66 {offsets = [0, 96], sizes = [8, 32], strides = [1, 1]} : vector<8x128xbf16> to vector<8x32xbf16>
    %cst_62 = arith.constant dense<0.000000e+00> : vector<8x32xf32>
    %144 = tpu.matmul %142, %143, %cst_62 {dimension_numbers = #tpu.dot_dimension_numbers<[1], [0], [0], [1], [0, 0, 1, 1], [], []>} : vector<8x8xbf16>, vector<8x32xbf16>, vector<8x32xf32> -> vector<8x32xf32>
    %145 = arith.truncf %144 : vector<8x32xf32> to vector<8x32xbf16>
    %c0_63 = arith.constant 0 : index
    %c96 = arith.constant 96 : index
    %146 = vector.load %arg26[%c0_63, %c96] : memref<8x128xbf16, #tpu.memory_space<vmem>>, vector<8x32xbf16>
    tpu.vector_store %arg26[%c0_63, %c96], %145 {strides = array<i32>} : memref<8x128xbf16, #tpu.memory_space<vmem>>, vector<8x32xbf16>,
    %c0_64 = arith.constant 0 : index
    %c0_65 = arith.constant 0 : index
    %147 = vector.load %arg26[%c0_64, %c0_65] : memref<8x128xbf16, #tpu.memory_space<vmem>>, vector<8x128xbf16>
    %c0_66 = arith.constant 0 : index
    %c0_67 = arith.constant 0 : index
    %148 = vector.load %arg7[%c0_66, %c0_67] : memref<128x128xbf16, #tpu.memory_space<vmem>>, vector<128x128xbf16>
    %cst_68 = arith.constant dense<0.000000e+00> : vector<8x128xf32>
    %149 = tpu.matmul %147, %148, %cst_68 {dimension_numbers = #tpu.dot_dimension_numbers<[1], [0], [0], [1], [0, 0, 1, 1], [], []>} : vector<8x128xbf16>, vector<128x128xbf16>, vector<8x128xf32> -> vector<8x128xf32>
    %c0_69 = arith.constant 0 : index
    %c0_70 = arith.constant 0 : index
    %150 = vector.load %arg8[%c0_69, %c0_70] : memref<1x128xf32, #tpu.memory_space<vmem>>, vector<1x128xf32>
    %151 = vector.broadcast %150 : vector<1x128xf32> to vector<8x128xf32>
    %152 = arith.addf %149, %151 : vector<8x128xf32>
    %153 = arith.addf %1, %152 : vector<8x128xf32>
    %c0_71 = arith.constant 0 : index
    %c0_72 = arith.constant 0 : index
    %154 = vector.load %arg15[%c0_71, %c0_72] : memref<1x128xf32, #tpu.memory_space<vmem>>, vector<1x128xf32>
    %c0_73 = arith.constant 0 : index
    %c0_74 = arith.constant 0 : index
    %155 = vector.load %arg16[%c0_73, %c0_74] : memref<1x128xf32, #tpu.memory_space<vmem>>, vector<1x128xf32>
    %cst_75 = arith.constant dense<0.000000e+00> : vector<8xf32>
    %156 = vector.multi_reduction <add>, %153, %cst_75 [1] : vector<8x128xf32> to vector<8xf32>
    %157 = vector.shape_cast %156 : vector<8xf32> to vector<8x1xf32>
    %cst_76 = arith.constant 1.280000e+02 : f32
    %158 = vector.broadcast %cst_76 : f32 to vector<8x1xf32>
    %159 = arith.divf %157, %158 : vector<8x1xf32>
    %160 = vector.broadcast %159 : vector<8x1xf32> to vector<8x128xf32>
    %161 = arith.subf %153, %160 : vector<8x128xf32>
    %162 = arith.mulf %161, %161 : vector<8x128xf32>
    %cst_77 = arith.constant dense<0.000000e+00> : vector<8xf32>
    %163 = vector.multi_reduction <add>, %162, %cst_77 [1] : vector<8x128xf32> to vector<8xf32>
    %164 = vector.shape_cast %163 : vector<8xf32> to vector<8x1xf32>
    %cst_78 = arith.constant 1.280000e+02 : f32
    %165 = vector.broadcast %cst_78 : f32 to vector<8x1xf32>
    %166 = arith.divf %164, %165 : vector<8x1xf32>
    %167 = vector.broadcast %159 : vector<8x1xf32> to vector<8x128xf32>
    %168 = arith.subf %153, %167 : vector<8x128xf32>
    %cst_79 = arith.constant 9.99999974E-6 : f32
    %169 = vector.broadcast %cst_79 : f32 to vector<8x1xf32>
    %170 = arith.addf %166, %169 : vector<8x1xf32>
    %171 = math.rsqrt %170 : vector<8x1xf32>
    %172 = vector.broadcast %171 : vector<8x1xf32> to vector<8x128xf32>
    %173 = arith.mulf %168, %172 : vector<8x128xf32>
    %174 = vector.broadcast %154 : vector<1x128xf32> to vector<8x128xf32>
    %175 = arith.mulf %173, %174 : vector<8x128xf32>
    %176 = vector.broadcast %155 : vector<1x128xf32> to vector<8x128xf32>
    %177 = arith.addf %175, %176 : vector<8x128xf32>
    %178 = arith.addf %177, %7 : vector<8x128xf32>
    %179 = arith.addf %4, %10 : vector<128x128xf32>
    %c0_80 = arith.constant 0 : index
    %c0_81 = arith.constant 0 : index
    %c0_82 = arith.constant 0 : index
    %180 = vector.load %arg9[%c0_80, %c0_81, %c0_82] : memref<3x128x128xbf16, #tpu.memory_space<vmem>>, vector<1x128x128xbf16>
    %181 = vector.shape_cast %180 : vector<1x128x128xbf16> to vector<128x128xbf16>
    %182 = arith.truncf %178 : vector<8x128xf32> to vector<8x128xbf16>
    %cst_83 = arith.constant dense<0.000000e+00> : vector<8x128xf32>
    %183 = tpu.matmul %182, %181, %cst_83 {dimension_numbers = #tpu.dot_dimension_numbers<[1], [0], [0], [1], [0, 0, 1, 1], [], []>} : vector<8x128xbf16>, vector<128x128xbf16>, vector<8x128xf32> -> vector<8x128xf32>
    %c0_84 = arith.constant 0 : index
    %c0_85 = arith.constant 0 : index
    %c0_86 = arith.constant 0 : index
    %184 = vector.load %arg10[%c0_84, %c0_85, %c0_86] : memref<3x1x128xf32, #tpu.memory_space<vmem>>, vector<1x1x128xf32>
    %185 = vector.shape_cast %184 : vector<1x1x128xf32> to vector<1x128xf32>
    %186 = vector.broadcast %185 : vector<1x128xf32> to vector<8x128xf32>
    %187 = arith.addf %183, %186 : vector<8x128xf32>
    %cst_87 = arith.constant 0.176776692 : f32
    %188 = vector.broadcast %cst_87 : f32 to vector<8x128xf32>
    %189 = arith.mulf %187, %188 : vector<8x128xf32>
    %190 = arith.truncf %189 : vector<8x128xf32> to vector<8x128xbf16>
    %c1_88 = arith.constant 1 : index
    %c0_89 = arith.constant 0 : index
    %c0_90 = arith.constant 0 : index
    %191 = vector.load %arg9[%c1_88, %c0_89, %c0_90] : memref<3x128x128xbf16, #tpu.memory_space<vmem>>, vector<1x128x128xbf16>
    %192 = vector.shape_cast %191 : vector<1x128x128xbf16> to vector<128x128xbf16>
    %193 = arith.truncf %179 : vector<128x128xf32> to vector<128x128xbf16>
    %cst_91 = arith.constant dense<0.000000e+00> : vector<128x128xf32>
    %194 = tpu.matmul %193, %192, %cst_91 {dimension_numbers = #tpu.dot_dimension_numbers<[1], [0], [0], [1], [0, 0, 1, 1], [], []>} : vector<128x128xbf16>, vector<128x128xbf16>, vector<128x128xf32> -> vector<128x128xf32>
    %c1_92 = arith.constant 1 : index
    %c0_93 = arith.constant 0 : index
    %c0_94 = arith.constant 0 : index
    %195 = vector.load %arg10[%c1_92, %c0_93, %c0_94] : memref<3x1x128xf32, #tpu.memory_space<vmem>>, vector<1x1x128xf32>
    %196 = vector.shape_cast %195 : vector<1x1x128xf32> to vector<1x128xf32>
    %197 = vector.broadcast %196 : vector<1x128xf32> to vector<128x128xf32>
    %198 = arith.addf %194, %197 : vector<128x128xf32>
    %199 = arith.truncf %198 : vector<128x128xf32> to vector<128x128xbf16>
    %c2_95 = arith.constant 2 : index
    %c0_96 = arith.constant 0 : index
    %c0_97 = arith.constant 0 : index
    %200 = vector.load %arg9[%c2_95, %c0_96, %c0_97] : memref<3x128x128xbf16, #tpu.memory_space<vmem>>, vector<1x128x128xbf16>
    %201 = vector.shape_cast %200 : vector<1x128x128xbf16> to vector<128x128xbf16>
    %202 = arith.truncf %4 : vector<128x128xf32> to vector<128x128xbf16>
    %cst_98 = arith.constant dense<0.000000e+00> : vector<128x128xf32>
    %203 = tpu.matmul %202, %201, %cst_98 {dimension_numbers = #tpu.dot_dimension_numbers<[1], [0], [0], [1], [0, 0, 1, 1], [], []>} : vector<128x128xbf16>, vector<128x128xbf16>, vector<128x128xf32> -> vector<128x128xf32>
    %c2_99 = arith.constant 2 : index
    %c0_100 = arith.constant 0 : index
    %c0_101 = arith.constant 0 : index
    %204 = vector.load %arg10[%c2_99, %c0_100, %c0_101] : memref<3x1x128xf32, #tpu.memory_space<vmem>>, vector<1x1x128xf32>
    %205 = vector.shape_cast %204 : vector<1x1x128xf32> to vector<1x128xf32>
    %206 = vector.broadcast %205 : vector<1x128xf32> to vector<128x128xf32>
    %207 = arith.addf %203, %206 : vector<128x128xf32>
    %208 = arith.truncf %207 : vector<128x128xf32> to vector<128x128xbf16>
    %209 = vector.extract_strided_slice %190 {offsets = [0, 0], sizes = [8, 32], strides = [1, 1]} : vector<8x128xbf16> to vector<8x32xbf16>
    %210 = vector.extract_strided_slice %199 {offsets = [0, 0], sizes = [128, 32], strides = [1, 1]} : vector<128x128xbf16> to vector<128x32xbf16>
    %cst_102 = arith.constant dense<0.000000e+00> : vector<8x128xf32>
    %211 = tpu.matmul %209, %210, %cst_102 {dimension_numbers = #tpu.dot_dimension_numbers<[1], [1], [0], [0], [0, 0, 1, 0], [], []>} : vector<8x32xbf16>, vector<128x32xbf16>, vector<8x128xf32> -> vector<8x128xf32>
    %212 = vector.broadcast %12 : vector<1x128xf32> to vector<8x128xf32>
    %213 = arith.addf %211, %212 : vector<8x128xf32>
    %cst_103 = arith.constant dense<0xFF800000> : vector<8xf32>
    %214 = vector.multi_reduction <maximumf>, %213, %cst_103 [1] : vector<8x128xf32> to vector<8xf32>
    %215 = vector.shape_cast %214 : vector<8xf32> to vector<8x1xf32>
    %216 = vector.broadcast %215 : vector<8x1xf32> to vector<8x128xf32>
    %217 = arith.subf %213, %216 : vector<8x128xf32>
    %218 = math.exp %217 : vector<8x128xf32>
    %cst_104 = arith.constant dense<0.000000e+00> : vector<8xf32>
    %219 = vector.multi_reduction <add>, %218, %cst_104 [1] : vector<8x128xf32> to vector<8xf32>
    %220 = vector.shape_cast %219 : vector<8xf32> to vector<8x1xf32>
    %221 = tpu.reciprocal %220 {approx = true} : vector<8x1xf32> -> vector<8x1xf32>
    %222 = vector.broadcast %221 : vector<8x1xf32> to vector<8x128xf32>
    %223 = arith.mulf %218, %222 : vector<8x128xf32>
    %224 = arith.truncf %223 : vector<8x128xf32> to vector<8x128xbf16>
    %225 = vector.extract_strided_slice %208 {offsets = [0, 0], sizes = [128, 32], strides = [1, 1]} : vector<128x128xbf16> to vector<128x32xbf16>
    %cst_105 = arith.constant dense<0.000000e+00> : vector<8x32xf32>
    %226 = tpu.matmul %224, %225, %cst_105 {dimension_numbers = #tpu.dot_dimension_numbers<[1], [0], [0], [1], [0, 0, 1, 1], [], []>} : vector<8x128xbf16>, vector<128x32xbf16>, vector<8x32xf32> -> vector<8x32xf32>
    %227 = arith.truncf %226 : vector<8x32xf32> to vector<8x32xbf16>
    %c0_106 = arith.constant 0 : index
    %c0_107 = arith.constant 0 : index
    %228 = vector.load %arg26[%c0_106, %c0_107] : memref<8x128xbf16, #tpu.memory_space<vmem>>, vector<8x32xbf16>
    tpu.vector_store %arg26[%c0_106, %c0_107], %227 {strides = array<i32>} : memref<8x128xbf16, #tpu.memory_space<vmem>>, vector<8x32xbf16>,
    %229 = vector.extract_strided_slice %190 {offsets = [0, 32], sizes = [8, 32], strides = [1, 1]} : vector<8x128xbf16> to vector<8x32xbf16>
    %230 = vector.extract_strided_slice %199 {offsets = [0, 32], sizes = [128, 32], strides = [1, 1]} : vector<128x128xbf16> to vector<128x32xbf16>
    %cst_108 = arith.constant dense<0.000000e+00> : vector<8x128xf32>
    %231 = tpu.matmul %229, %230, %cst_108 {dimension_numbers = #tpu.dot_dimension_numbers<[1], [1], [0], [0], [0, 0, 1, 0], [], []>} : vector<8x32xbf16>, vector<128x32xbf16>, vector<8x128xf32> -> vector<8x128xf32>
    %232 = vector.broadcast %12 : vector<1x128xf32> to vector<8x128xf32>
    %233 = arith.addf %231, %232 : vector<8x128xf32>
    %cst_109 = arith.constant dense<0xFF800000> : vector<8xf32>
    %234 = vector.multi_reduction <maximumf>, %233, %cst_109 [1] : vector<8x128xf32> to vector<8xf32>
    %235 = vector.shape_cast %234 : vector<8xf32> to vector<8x1xf32>
    %236 = vector.broadcast %235 : vector<8x1xf32> to vector<8x128xf32>
    %237 = arith.subf %233, %236 : vector<8x128xf32>
    %238 = math.exp %237 : vector<8x128xf32>
    %cst_110 = arith.constant dense<0.000000e+00> : vector<8xf32>
    %239 = vector.multi_reduction <add>, %238, %cst_110 [1] : vector<8x128xf32> to vector<8xf32>
    %240 = vector.shape_cast %239 : vector<8xf32> to vector<8x1xf32>
    %241 = tpu.reciprocal %240 {approx = true} : vector<8x1xf32> -> vector<8x1xf32>
    %242 = vector.broadcast %241 : vector<8x1xf32> to vector<8x128xf32>
    %243 = arith.mulf %238, %242 : vector<8x128xf32>
    %244 = arith.truncf %243 : vector<8x128xf32> to vector<8x128xbf16>
    %245 = vector.extract_strided_slice %208 {offsets = [0, 32], sizes = [128, 32], strides = [1, 1]} : vector<128x128xbf16> to vector<128x32xbf16>
    %cst_111 = arith.constant dense<0.000000e+00> : vector<8x32xf32>
    %246 = tpu.matmul %244, %245, %cst_111 {dimension_numbers = #tpu.dot_dimension_numbers<[1], [0], [0], [1], [0, 0, 1, 1], [], []>} : vector<8x128xbf16>, vector<128x32xbf16>, vector<8x32xf32> -> vector<8x32xf32>
    %247 = arith.truncf %246 : vector<8x32xf32> to vector<8x32xbf16>
    %c0_112 = arith.constant 0 : index
    %c32_113 = arith.constant 32 : index
    %248 = vector.load %arg26[%c0_112, %c32_113] : memref<8x128xbf16, #tpu.memory_space<vmem>>, vector<8x32xbf16>
    tpu.vector_store %arg26[%c0_112, %c32_113], %247 {strides = array<i32>} : memref<8x128xbf16, #tpu.memory_space<vmem>>, vector<8x32xbf16>,
    %249 = vector.extract_strided_slice %190 {offsets = [0, 64], sizes = [8, 32], strides = [1, 1]} : vector<8x128xbf16> to vector<8x32xbf16>
    %250 = vector.extract_strided_slice %199 {offsets = [0, 64], sizes = [128, 32], strides = [1, 1]} : vector<128x128xbf16> to vector<128x32xbf16>
    %cst_114 = arith.constant dense<0.000000e+00> : vector<8x128xf32>
    %251 = tpu.matmul %249, %250, %cst_114 {dimension_numbers = #tpu.dot_dimension_numbers<[1], [1], [0], [0], [0, 0, 1, 0], [], []>} : vector<8x32xbf16>, vector<128x32xbf16>, vector<8x128xf32> -> vector<8x128xf32>
    %252 = vector.broadcast %12 : vector<1x128xf32> to vector<8x128xf32>
    %253 = arith.addf %251, %252 : vector<8x128xf32>
    %cst_115 = arith.constant dense<0xFF800000> : vector<8xf32>
    %254 = vector.multi_reduction <maximumf>, %253, %cst_115 [1] : vector<8x128xf32> to vector<8xf32>
    %255 = vector.shape_cast %254 : vector<8xf32> to vector<8x1xf32>
    %256 = vector.broadcast %255 : vector<8x1xf32> to vector<8x128xf32>
    %257 = arith.subf %253, %256 : vector<8x128xf32>
    %258 = math.exp %257 : vector<8x128xf32>
    %cst_116 = arith.constant dense<0.000000e+00> : vector<8xf32>
    %259 = vector.multi_reduction <add>, %258, %cst_116 [1] : vector<8x128xf32> to vector<8xf32>
    %260 = vector.shape_cast %259 : vector<8xf32> to vector<8x1xf32>
    %261 = tpu.reciprocal %260 {approx = true} : vector<8x1xf32> -> vector<8x1xf32>
    %262 = vector.broadcast %261 : vector<8x1xf32> to vector<8x128xf32>
    %263 = arith.mulf %258, %262 : vector<8x128xf32>
    %264 = arith.truncf %263 : vector<8x128xf32> to vector<8x128xbf16>
    %265 = vector.extract_strided_slice %208 {offsets = [0, 64], sizes = [128, 32], strides = [1, 1]} : vector<128x128xbf16> to vector<128x32xbf16>
    %cst_117 = arith.constant dense<0.000000e+00> : vector<8x32xf32>
    %266 = tpu.matmul %264, %265, %cst_117 {dimension_numbers = #tpu.dot_dimension_numbers<[1], [0], [0], [1], [0, 0, 1, 1], [], []>} : vector<8x128xbf16>, vector<128x32xbf16>, vector<8x32xf32> -> vector<8x32xf32>
    %267 = arith.truncf %266 : vector<8x32xf32> to vector<8x32xbf16>
    %c0_118 = arith.constant 0 : index
    %c64_119 = arith.constant 64 : index
    %268 = vector.load %arg26[%c0_118, %c64_119] : memref<8x128xbf16, #tpu.memory_space<vmem>>, vector<8x32xbf16>
    tpu.vector_store %arg26[%c0_118, %c64_119], %267 {strides = array<i32>} : memref<8x128xbf16, #tpu.memory_space<vmem>>, vector<8x32xbf16>,
    %269 = vector.extract_strided_slice %190 {offsets = [0, 96], sizes = [8, 32], strides = [1, 1]} : vector<8x128xbf16> to vector<8x32xbf16>
    %270 = vector.extract_strided_slice %199 {offsets = [0, 96], sizes = [128, 32], strides = [1, 1]} : vector<128x128xbf16> to vector<128x32xbf16>
    %cst_120 = arith.constant dense<0.000000e+00> : vector<8x128xf32>
    %271 = tpu.matmul %269, %270, %cst_120 {dimension_numbers = #tpu.dot_dimension_numbers<[1], [1], [0], [0], [0, 0, 1, 0], [], []>} : vector<8x32xbf16>, vector<128x32xbf16>, vector<8x128xf32> -> vector<8x128xf32>
    %272 = vector.broadcast %12 : vector<1x128xf32> to vector<8x128xf32>
    %273 = arith.addf %271, %272 : vector<8x128xf32>
    %cst_121 = arith.constant dense<0xFF800000> : vector<8xf32>
    %274 = vector.multi_reduction <maximumf>, %273, %cst_121 [1] : vector<8x128xf32> to vector<8xf32>
    %275 = vector.shape_cast %274 : vector<8xf32> to vector<8x1xf32>
    %276 = vector.broadcast %275 : vector<8x1xf32> to vector<8x128xf32>
    %277 = arith.subf %273, %276 : vector<8x128xf32>
    %278 = math.exp %277 : vector<8x128xf32>
    %cst_122 = arith.constant dense<0.000000e+00> : vector<8xf32>
    %279 = vector.multi_reduction <add>, %278, %cst_122 [1] : vector<8x128xf32> to vector<8xf32>
    %280 = vector.shape_cast %279 : vector<8xf32> to vector<8x1xf32>
    %281 = tpu.reciprocal %280 {approx = true} : vector<8x1xf32> -> vector<8x1xf32>
    %282 = vector.broadcast %281 : vector<8x1xf32> to vector<8x128xf32>
    %283 = arith.mulf %278, %282 : vector<8x128xf32>
    %284 = arith.truncf %283 : vector<8x128xf32> to vector<8x128xbf16>
    %285 = vector.extract_strided_slice %208 {offsets = [0, 96], sizes = [128, 32], strides = [1, 1]} : vector<128x128xbf16> to vector<128x32xbf16>
    %cst_123 = arith.constant dense<0.000000e+00> : vector<8x32xf32>
    %286 = tpu.matmul %284, %285, %cst_123 {dimension_numbers = #tpu.dot_dimension_numbers<[1], [0], [0], [1], [0, 0, 1, 1], [], []>} : vector<8x128xbf16>, vector<128x32xbf16>, vector<8x32xf32> -> vector<8x32xf32>
    %287 = arith.truncf %286 : vector<8x32xf32> to vector<8x32xbf16>
    %c0_124 = arith.constant 0 : index
    %c96_125 = arith.constant 96 : index
    %288 = vector.load %arg26[%c0_124, %c96_125] : memref<8x128xbf16, #tpu.memory_space<vmem>>, vector<8x32xbf16>
    tpu.vector_store %arg26[%c0_124, %c96_125], %287 {strides = array<i32>} : memref<8x128xbf16, #tpu.memory_space<vmem>>, vector<8x32xbf16>,
    %c0_126 = arith.constant 0 : index
    %c0_127 = arith.constant 0 : index
    %289 = vector.load %arg26[%c0_126, %c0_127] : memref<8x128xbf16, #tpu.memory_space<vmem>>, vector<8x128xbf16>
    %c0_128 = arith.constant 0 : index
    %c0_129 = arith.constant 0 : index
    %290 = vector.load %arg11[%c0_128, %c0_129] : memref<128x128xbf16, #tpu.memory_space<vmem>>, vector<128x128xbf16>
    %cst_130 = arith.constant dense<0.000000e+00> : vector<8x128xf32>
    %291 = tpu.matmul %289, %290, %cst_130 {dimension_numbers = #tpu.dot_dimension_numbers<[1], [0], [0], [1], [0, 0, 1, 1], [], []>} : vector<8x128xbf16>, vector<128x128xbf16>, vector<8x128xf32> -> vector<8x128xf32>
    %c0_131 = arith.constant 0 : index
    %c0_132 = arith.constant 0 : index
    %292 = vector.load %arg12[%c0_131, %c0_132] : memref<1x128xf32, #tpu.memory_space<vmem>>, vector<1x128xf32>
    %293 = vector.broadcast %292 : vector<1x128xf32> to vector<8x128xf32>
    %294 = arith.addf %291, %293 : vector<8x128xf32>
    %295 = arith.addf %153, %294 : vector<8x128xf32>
    %c0_133 = arith.constant 0 : index
    %c0_134 = arith.constant 0 : index
    %296 = vector.load %arg17[%c0_133, %c0_134] : memref<1x128xf32, #tpu.memory_space<vmem>>, vector<1x128xf32>
    %c0_135 = arith.constant 0 : index
    %c0_136 = arith.constant 0 : index
    %297 = vector.load %arg18[%c0_135, %c0_136] : memref<1x128xf32, #tpu.memory_space<vmem>>, vector<1x128xf32>
    %cst_137 = arith.constant dense<0.000000e+00> : vector<8xf32>
    %298 = vector.multi_reduction <add>, %295, %cst_137 [1] : vector<8x128xf32> to vector<8xf32>
    %299 = vector.shape_cast %298 : vector<8xf32> to vector<8x1xf32>
    %cst_138 = arith.constant 1.280000e+02 : f32
    %300 = vector.broadcast %cst_138 : f32 to vector<8x1xf32>
    %301 = arith.divf %299, %300 : vector<8x1xf32>
    %302 = vector.broadcast %301 : vector<8x1xf32> to vector<8x128xf32>
    %303 = arith.subf %295, %302 : vector<8x128xf32>
    %304 = arith.mulf %303, %303 : vector<8x128xf32>
    %cst_139 = arith.constant dense<0.000000e+00> : vector<8xf32>
    %305 = vector.multi_reduction <add>, %304, %cst_139 [1] : vector<8x128xf32> to vector<8xf32>
    %306 = vector.shape_cast %305 : vector<8xf32> to vector<8x1xf32>
    %cst_140 = arith.constant 1.280000e+02 : f32
    %307 = vector.broadcast %cst_140 : f32 to vector<8x1xf32>
    %308 = arith.divf %306, %307 : vector<8x1xf32>
    %309 = vector.broadcast %301 : vector<8x1xf32> to vector<8x128xf32>
    %310 = arith.subf %295, %309 : vector<8x128xf32>
    %cst_141 = arith.constant 9.99999974E-6 : f32
    %311 = vector.broadcast %cst_141 : f32 to vector<8x1xf32>
    %312 = arith.addf %308, %311 : vector<8x1xf32>
    %313 = math.rsqrt %312 : vector<8x1xf32>
    %314 = vector.broadcast %313 : vector<8x1xf32> to vector<8x128xf32>
    %315 = arith.mulf %310, %314 : vector<8x128xf32>
    %316 = vector.broadcast %296 : vector<1x128xf32> to vector<8x128xf32>
    %317 = arith.mulf %315, %316 : vector<8x128xf32>
    %318 = vector.broadcast %297 : vector<1x128xf32> to vector<8x128xf32>
    %319 = arith.addf %317, %318 : vector<8x128xf32>
    %c0_142 = arith.constant 0 : index
    %c0_143 = arith.constant 0 : index
    %320 = vector.load %arg19[%c0_142, %c0_143] : memref<128x256xbf16, #tpu.memory_space<vmem>>, vector<128x256xbf16>
    %321 = arith.truncf %319 : vector<8x128xf32> to vector<8x128xbf16>
    %cst_144 = arith.constant dense<0.000000e+00> : vector<8x256xf32>
    %322 = tpu.matmul %321, %320, %cst_144 {dimension_numbers = #tpu.dot_dimension_numbers<[1], [0], [0], [1], [0, 0, 1, 1], [], []>} : vector<8x128xbf16>, vector<128x256xbf16>, vector<8x256xf32> -> vector<8x256xf32>
    %c0_145 = arith.constant 0 : index
    %c0_146 = arith.constant 0 : index
    %323 = vector.load %arg20[%c0_145, %c0_146] : memref<1x256xf32, #tpu.memory_space<vmem>>, vector<1x256xf32>
    %324 = vector.broadcast %323 : vector<1x256xf32> to vector<8x256xf32>
    %325 = arith.addf %322, %324 : vector<8x256xf32>
    %cst_147 = arith.constant 0.000000e+00 : f32
    %326 = vector.broadcast %cst_147 : f32 to vector<8x256xf32>
    %327 = arith.maximumf %325, %326 : vector<8x256xf32>
    %c0_148 = arith.constant 0 : index
    %c0_149 = arith.constant 0 : index
    %328 = vector.load %arg21[%c0_148, %c0_149] : memref<256x128xbf16, #tpu.memory_space<vmem>>, vector<256x128xbf16>
    %329 = arith.truncf %327 : vector<8x256xf32> to vector<8x256xbf16>
    %cst_150 = arith.constant dense<0.000000e+00> : vector<8x128xf32>
    %330 = tpu.matmul %329, %328, %cst_150 {dimension_numbers = #tpu.dot_dimension_numbers<[1], [0], [0], [1], [0, 0, 1, 1], [], []>} : vector<8x256xbf16>, vector<256x128xbf16>, vector<8x128xf32> -> vector<8x128xf32>
    %331 = arith.addf %295, %330 : vector<8x128xf32>
    %c0_151 = arith.constant 0 : index
    %c0_152 = arith.constant 0 : index
    %332 = vector.load %arg22[%c0_151, %c0_152] : memref<1x128xf32, #tpu.memory_space<vmem>>, vector<1x128xf32>
    %333 = vector.broadcast %332 : vector<1x128xf32> to vector<8x128xf32>
    %334 = arith.addf %331, %333 : vector<8x128xf32>
    %335 = vector.shape_cast %334 : vector<8x128xf32> to vector<1x8x128xf32>
    %c0_153 = arith.constant 0 : index
    %c0_154 = arith.constant 0 : index
    %c0_155 = arith.constant 0 : index
    %336 = vector.load %arg25[%c0_153, %c0_154, %c0_155] : memref<1x8x128xf32, #tpu.memory_space<vmem>>, vector<1x8x128xf32>
    tpu.vector_store %arg25[%c0_153, %c0_154, %c0_155], %335 {strides = array<i32>} : memref<1x8x128xf32, #tpu.memory_space<vmem>>, vector<1x8x128xf32>,
    return
  }
  func.func @transform_0(%arg0: i32) -> (i32, i32, i32) {
    %c0_i32 = arith.constant 0 : i32
    %c0_i32_0 = arith.constant 0 : i32
    %c0_i32_1 = arith.constant 0 : i32
    return %arg0, %c0_i32, %c0_i32_0 : i32, i32, i32
  }
  func.func @transform_1(%arg0: i32) -> (i32, i32, i32) {
    %c0_i32 = arith.constant 0 : i32
    %c0_i32_0 = arith.constant 0 : i32
    %c0_i32_1 = arith.constant 0 : i32
    return %arg0, %c0_i32, %c0_i32_0 : i32, i32, i32
  }
  func.func @transform_2(%arg0: i32) -> (i32, i32, i32) {
    %c0_i32 = arith.constant 0 : i32
    %c0_i32_0 = arith.constant 0 : i32
    %c0_i32_1 = arith.constant 0 : i32
    return %arg0, %c0_i32, %c0_i32_0 : i32, i32, i32
  }
  func.func @transform_3(%arg0: i32) -> (i32, i32, i32) {
    %c0_i32 = arith.constant 0 : i32
    %c0_i32_0 = arith.constant 0 : i32
    %c0_i32_1 = arith.constant 0 : i32
    return %arg0, %c0_i32, %c0_i32_0 : i32, i32, i32
  }
  func.func @transform_4(%arg0: i32) -> (i32, i32, i32) {
    %c0_i32 = arith.constant 0 : i32
    %c0_i32_0 = arith.constant 0 : i32
    %c0_i32_1 = arith.constant 0 : i32
    %c0_i32_2 = arith.constant 0 : i32
    return %c0_i32, %c0_i32_0, %c0_i32_1 : i32, i32, i32
  }
  func.func @transform_5(%arg0: i32) -> (i32, i32, i32) {
    %c0_i32 = arith.constant 0 : i32
    %c0_i32_0 = arith.constant 0 : i32
    %c0_i32_1 = arith.constant 0 : i32
    %c0_i32_2 = arith.constant 0 : i32
    return %c0_i32, %c0_i32_0, %c0_i32_1 : i32, i32, i32
  }
  func.func @transform_6(%arg0: i32) -> (i32, i32) {
    %c0_i32 = arith.constant 0 : i32
    %c0_i32_0 = arith.constant 0 : i32
    %c0_i32_1 = arith.constant 0 : i32
    return %c0_i32, %c0_i32_0 : i32, i32
  }
  func.func @transform_7(%arg0: i32) -> (i32, i32) {
    %c0_i32 = arith.constant 0 : i32
    %c0_i32_0 = arith.constant 0 : i32
    %c0_i32_1 = arith.constant 0 : i32
    return %c0_i32, %c0_i32_0 : i32, i32
  }
  func.func @transform_8(%arg0: i32) -> (i32, i32, i32) {
    %c0_i32 = arith.constant 0 : i32
    %c0_i32_0 = arith.constant 0 : i32
    %c0_i32_1 = arith.constant 0 : i32
    %c0_i32_2 = arith.constant 0 : i32
    return %c0_i32, %c0_i32_0, %c0_i32_1 : i32, i32, i32
  }
  func.func @transform_9(%arg0: i32) -> (i32, i32, i32) {
    %c0_i32 = arith.constant 0 : i32
    %c0_i32_0 = arith.constant 0 : i32
    %c0_i32_1 = arith.constant 0 : i32
    %c0_i32_2 = arith.constant 0 : i32
    return %c0_i32, %c0_i32_0, %c0_i32_1 : i32, i32, i32
  }
  func.func @transform_10(%arg0: i32) -> (i32, i32) {
    %c0_i32 = arith.constant 0 : i32
    %c0_i32_0 = arith.constant 0 : i32
    %c0_i32_1 = arith.constant 0 : i32
    return %c0_i32, %c0_i32_0 : i32, i32
  }
  func.func @transform_11(%arg0: i32) -> (i32, i32) {
    %c0_i32 = arith.constant 0 : i32
    %c0_i32_0 = arith.constant 0 : i32
    %c0_i32_1 = arith.constant 0 : i32
    return %c0_i32, %c0_i32_0 : i32, i32
  }
  func.func @transform_12(%arg0: i32) -> (i32, i32) {
    %c0_i32 = arith.constant 0 : i32
    %c0_i32_0 = arith.constant 0 : i32
    %c0_i32_1 = arith.constant 0 : i32
    return %c0_i32, %c0_i32_0 : i32, i32
  }
  func.func @transform_13(%arg0: i32) -> (i32, i32) {
    %c0_i32 = arith.constant 0 : i32
    %c0_i32_0 = arith.constant 0 : i32
    %c0_i32_1 = arith.constant 0 : i32
    return %c0_i32, %c0_i32_0 : i32, i32
  }
  func.func @transform_14(%arg0: i32) -> (i32, i32) {
    %c0_i32 = arith.constant 0 : i32
    %c0_i32_0 = arith.constant 0 : i32
    %c0_i32_1 = arith.constant 0 : i32
    return %c0_i32, %c0_i32_0 : i32, i32
  }
  func.func @transform_15(%arg0: i32) -> (i32, i32) {
    %c0_i32 = arith.constant 0 : i32
    %c0_i32_0 = arith.constant 0 : i32
    %c0_i32_1 = arith.constant 0 : i32
    return %c0_i32, %c0_i32_0 : i32, i32
  }
  func.func @transform_16(%arg0: i32) -> (i32, i32) {
    %c0_i32 = arith.constant 0 : i32
    %c0_i32_0 = arith.constant 0 : i32
    %c0_i32_1 = arith.constant 0 : i32
    return %c0_i32, %c0_i32_0 : i32, i32
  }
  func.func @transform_17(%arg0: i32) -> (i32, i32) {
    %c0_i32 = arith.constant 0 : i32
    %c0_i32_0 = arith.constant 0 : i32
    %c0_i32_1 = arith.constant 0 : i32
    return %c0_i32, %c0_i32_0 : i32, i32
  }
  func.func @transform_18(%arg0: i32) -> (i32, i32) {
    %c0_i32 = arith.constant 0 : i32
    %c0_i32_0 = arith.constant 0 : i32
    %c0_i32_1 = arith.constant 0 : i32
    return %c0_i32, %c0_i32_0 : i32, i32
  }
  func.func @transform_19(%arg0: i32) -> (i32, i32) {
    %c0_i32 = arith.constant 0 : i32
    %c0_i32_0 = arith.constant 0 : i32
    %c0_i32_1 = arith.constant 0 : i32
    return %c0_i32, %c0_i32_0 : i32, i32
  }
  func.func @transform_20(%arg0: i32) -> (i32, i32) {
    %c0_i32 = arith.constant 0 : i32
    %c0_i32_0 = arith.constant 0 : i32
    %c0_i32_1 = arith.constant 0 : i32
    return %c0_i32, %c0_i32_0 : i32, i32
  }
  func.func @transform_21(%arg0: i32) -> (i32, i32) {
    %c0_i32 = arith.constant 0 : i32
    %c0_i32_0 = arith.constant 0 : i32
    %c0_i32_1 = arith.constant 0 : i32
    return %c0_i32, %c0_i32_0 : i32, i32
  }
  func.func @transform_22(%arg0: i32) -> (i32, i32) {
    %c0_i32 = arith.constant 0 : i32
    %c0_i32_0 = arith.constant 0 : i32
    %c0_i32_1 = arith.constant 0 : i32
    return %c0_i32, %c0_i32_0 : i32, i32
  }
  func.func @transform_23(%arg0: i32) -> (i32, i32) {
    %c0_i32 = arith.constant 0 : i32
    %c0_i32_0 = arith.constant 0 : i32
    %c0_i32_1 = arith.constant 0 : i32
    return %c0_i32, %c0_i32_0 : i32, i32
  }
  func.func @transform_24(%arg0: i32) -> (i32, i32, i32) {
    %c0_i32 = arith.constant 0 : i32
    %c0_i32_0 = arith.constant 0 : i32
    %c0_i32_1 = arith.constant 0 : i32
    return %arg0, %c0_i32, %c0_i32_0 : i32, i32, i32
  }
}

</mosaic_0001>

<bundles_post_ra>
// kernel: decoder_layer_forward.1
= control target key start
LH: loop header
LB: loop body
LE: loop exit
PB: predicated region body
PF: predicated region fallthrough
CT: control target
= control target key end

     0   :  { %s4561_s0 = inlined_call_operand.vmem [shape: f32[2,8,128], index: 0, kind: input, shape index: {}]   ;;  %s4562_s1 = inlined_call_operand.vmem [shape: bf16[2,128,128], index: 1, kind: input, shape index: {}]   ;;  %s4563_s2 = inlined_call_operand.vmem [shape: bf16[2,8,128], index: 2, kind: input, shape index: {}]   ;;  %s4564_s3 = inlined_call_operand.vmem [shape: bf16[2,128,128], index: 3, kind: input, shape index: {}]   ;;  %s4565_s4 = inlined_call_operand.vmem [shape: bf16[3,128,128], index: 4, kind: input, shape index: {}]   ;;  %s4566_s5 = inlined_call_operand.vmem [shape: f32[3,1,128], index: 5, kind: input, shape index: {}]   ;;  %s4567_s6 = inlined_call_operand.vmem [shape: bf16[128,128], index: 6, kind: input, shape index: {}]   ;;  %s4568_s7 = inlined_call_operand.vmem [shape: f32[1,128], index: 7, kind: input, shape index: {}]   ;;  %s4569_s8 = inlined_call_operand.vmem [shape: bf16[3,128,128], index: 8, kind: input, shape index: {}]   ;;  %s4570_s9 = inlined_call_operand.vmem [shape: f32[3,1,128], index: 9, kind: input, shape index: {}]   ;;  %s4571_s10 = inlined_call_operand.vmem [shape: bf16[128,128], index: 10, kind: input, shape index: {}]   ;;  %s4572_s11 = inlined_call_operand.vmem [shape: f32[1,128], index: 11, kind: input, shape index: {}]   ;;  %s4573_s12 = inlined_call_operand.vmem [shape: f32[1,128], index: 12, kind: input, shape index: {}]   ;;  %s4574_s13 = inlined_call_operand.vmem [shape: f32[1,128], index: 13, kind: input, shape index: {}]   ;;  %s4575_s14 = inlined_call_operand.vmem [shape: f32[1,128], index: 14, kind: input, shape index: {}]   ;;  %s4576_s15 = inlined_call_operand.vmem [shape: f32[1,128], index: 15, kind: input, shape index: {}]   ;;  %s4577_s16 = inlined_call_operand.vmem [shape: f32[1,128], index: 16, kind: input, shape index: {}]   ;;  %s4578_s17 = inlined_call_operand.vmem [shape: f32[1,128], index: 17, kind: input, shape index: {}]   ;;  %s4579_s18 = inlined_call_operand.vmem [shape: bf16[128,256], index: 18, kind: input, shape index: {}]   ;;  %s4580_s19 = inlined_call_operand.vmem [shape: f32[1,256], index: 19, kind: input, shape index: {}]   ;;  %s4581_s20 = inlined_call_operand.vmem [shape: bf16[256,128], index: 20, kind: input, shape index: {}]   ;;  %s4582_s21 = inlined_call_operand.vmem [shape: f32[1,128], index: 21, kind: input, shape index: {}]   ;;  %s4583_s22 = inlined_call_operand.vmem [shape: f32[1,8], index: 22, kind: input, shape index: {}]   ;;  %s4584_s23 = inlined_call_operand.vmem [shape: f32[1,128], index: 23, kind: input, shape index: {}]   ;;  %s4585_s24 = inlined_call_operand.vmem [shape: f32[2,8,128], index: 24, kind: output, shape index: {}]  }
   0x1   :  { %4599 = sst [smem:[#allocation3_spill]] %s4561_s0 }
   0x2   :  { %4600 = sst [smem:[#allocation4_spill]] %s4562_s1 }
   0x3   :  { %4601 = sst [smem:[#allocation5_spill]] %s4563_s2 }
   0x4   :  { %4602 = sst [smem:[#allocation6_spill]] %s4564_s3 }
   0x5   :  { %4603 = sst [smem:[#allocation7_spill]] %s4565_s4 }
   0x6   :  { %4604 = sst [smem:[#allocation8_spill]] %s4566_s5  ;;  %s3797_s5 = smov 0  }
   0x7   :  { %4605 = sst [smem:[#allocation9_spill]] %s4567_s6 }
   0x8   :  { %4606 = sst [smem:[#allocation10_spill]] %s4568_s7 }
   0x9   :  { %4607 = sst [smem:[#allocation11_spill]] %s4569_s8 }
   0xa   :  { %4608 = sst [smem:[#allocation12_spill]] %s4573_s12 }
   0xb   :  { %4609 = sst [smem:[#allocation13_spill]] %s4574_s13 }
   0xc LB: > { %s2936_s26 = sadd.s32 4294967295, %s3666_s5   ;;  %p2940_p0 = scmp.ge.s32.totalorder %s3666_s5, 1  ;;  %s3666_s5 = sphi %s3797_s5, %s34_s5  }
   0xd   : > { %p690_p1 = scmp.lt.s32.totalorder %s3666_s5, 3 }
   0xf   : > { %p691_p2 = pnand %p2940_p0, %p690_p1 }
  0x10   : > { %p768_p3 = scmp.lt.s32.totalorder (!%p691_p2), %s2936_s26, 1  ;;  %s4610_s2 = sld [smem:[#allocation3_spill]] (!%p691_p2) }
  0x11   : > { %694 = sbr.rel (%p691_p2) target bundleno = 3737 (0xe99), region = 116  ;;  %s4611_s30 = sld [smem:[#allocation7_spill]] (!%p691_p2) }
  0x12   : > { %s4612_s28 = sld [smem:[#allocation5_spill]] (!%p691_p2)  ;;  %s4591_s0 = smov (!%p691_p2), 32  }
  0x13   : > { %s4613_s12 = sld [smem:[#allocation12_spill]] (!%p691_p2) }
  0x14   : > { %s4614_s13 = sld [smem:[#allocation13_spill]] (!%p691_p2) }
  0x15   : > { %s4616_s1 = sld [smem:[#allocation9_spill]] (!%p691_p2) }
  0x16   : > { %s4626_s26 = smov (!%p768_p3, %s2936_s26), 1  ;;  %v3668_v1 = vmov 128.0   ;;  %vm1154_vm4 = vcmask 261120   ;;  %vm1190_vm5 = vcmask 1043456   ;;  %vm1174_vm6 = vcmask 64512   ;;  %s4617_s4 = sld [smem:[#allocation11_spill]] }
  0x17   : > { %s4590_s27 = sshll.u32 %s4626_s26, 3  ;;  %3620 = vrcp.f32 %v3668_v1  ;;  %v3479_v2 = vld [vmem:[%s4611_s30 + $0xb8] sm:$0xff]  ;;  %v3478_v15 = vld [vmem:[%s4611_s30 + $0xb0] sm:$0xff]  ;;  %v3477_v18 = vld [vmem:[%s4611_s30 + $0xa8] sm:$0xff]  ;;  %s2944_s8 = sshll.u32 %s4626_s26, 2  ;;  %vm1208_vm7 = vcmask 257024  }
  0x18   : > { %s771_s29 = scalar_lea.vmem %s4610_s2, %s4590_s27  ;;  %1137 = vmatpush.bf16.msra.mxu2 %v3479_v2  ;;  %v3463_v13 = vld [vmem:[%s4611_s30 + $0x38] sm:$0xff]  ;;  %v3462_v16 = vld [vmem:[%s4611_s30 + $0x30] sm:$0xff]  ;;  %v3461_v19 = vld [vmem:[%s4611_s30 + $0x28] sm:$0xff]  ;;  %s780_s6 = scalar_lea.vmem %s4612_s28, %s2944_s8  ;;  %vm1280_vm8 = vcmask 519424   ;;  %vm1343_vm9 = vcmask 781824   ;;  %vm1406_vm10 = vcmask 1044224  }
  0x19   : > { %v3813_v0 = vld [vmem:[%s771_s29] sm:$0xff]  ;;  %v3471_v14 = vld [vmem:[%s4611_s30 + $0x78] sm:$0xff]  ;;  %967 = vmatpush.bf16.msra.mxu0 %v3463_v13  ;;  %v3470_v17 = vld [vmem:[%s4611_s30 + $0x70] sm:$0xff]  ;;  %s4615_s8 = sld [smem:[#allocation8_spill]]  ;;  %s4593_s2 = smov 64  }
  0x1a   : > { %862 = vadd.xlane.f32.xlu0 %v3813_v0  ;;  %1052 = vmatpush.bf16.msra.mxu1 %v3471_v14  ;;  %v3469_v20 = vld [vmem:[%s4611_s30 + $0x68] sm:$0xff]  ;;  %v3476_v21 = vld [vmem:[%s4611_s30 + $0xa0] sm:$0xff]  ;;  %v3475_v24 = vld [vmem:[%s4611_s30 + $0x98] sm:$0xff]  ;;  %s4595_s29 = smov 96   ;;  %s4618_s25 = sld [smem:[#allocation4_spill]] }
  0x1b   : > { %v3460_v22 = vld [vmem:[%s4611_s30 + $0x20] sm:$0xff]  ;;  %v3459_v25 = vld [vmem:[%s4611_s30 + $0x18] sm:$0xff]  ;;  %v3474_v27 = vld [vmem:[%s4611_s30 + $0x90] sm:$0xff] }
  0x1c   : > { %1138 = vmatpush.bf16.msra.mxu2 %v3478_v15  ;;  %v3468_v23 = vld [vmem:[%s4611_s30 + $0x60] sm:$0xff]  ;;  %v3467_v26 = vld [vmem:[%s4611_s30 + $0x58] sm:$0xff]  ;;  %v3458_v28 = vld [vmem:[%s4611_s30 + $0x10] sm:$0xff] }
  0x1d   : > { %v3621_v3 = vpop.eup %3620  ;;  %968 = vmatpush.bf16.msra.mxu0 %v3462_v16  ;;  %v3466_v29 = vld [vmem:[%s4611_s30 + $0x50] sm:$0xff]  ;;  %v3473_v30 = vld [vmem:[%s4611_s30 + $0x88] sm:$0xff]  ;;  %v3472_v33 = vld [vmem:[%s4611_s30 + $0x80] sm:$0xff] }
  0x1e   : > { %v865_v4 = vmul.f32 128.0, %v3621_v3  ;;  %vm869_vm0 = vweird.f32 %v3621_v3  ;;  %1053 = vmatpush.bf16.msra.mxu1 %v3470_v17  ;;  %v3457_v31 = vld [vmem:[%s4611_s30 + $0x8] sm:$0xff]  ;;  %v3456_v34 = vld [vmem:[%s4611_s30] sm:$0xff] }
  0x1f   : > { %v3465_v32 = vld [vmem:[%s4611_s30 + $0x48] sm:$0xff]  ;;  %v3464_v35 = vld [vmem:[%s4611_s30 + $0x40] sm:$0xff] }
  0x20   : > { %v866_v5 = vsub.f32 1.0, %v865_v4  ;;  %1139 = vmatpush.bf16.msra.mxu2 %v3477_v18  ;;  %v3603_v45 = vld [vmem:[%s4613_s12] ss:$0 sm:$0xff]  ;;  %v3606_v57 = vld [vmem:[%s4615_s8 + $0x1] ss:$0 sm:$0xff]  ;;  %s4619_s12 = sld [smem:[#allocation6_spill]] }
  0x21   : > { %969 = vmatpush.bf16.msra.mxu0 %v3461_v19  ;;  %v3904_v47 = vld [vmem:[%s780_s6] sm:$0xf] }
  0x22   : > { %v867_v6 = vmul.f32 %v3621_v3, %v866_v5  ;;  %1054 = vmatpush.bf16.msra.mxu1 %v3469_v20  ;;  %v3604_v49 = vld [vmem:[%s4614_s13] ss:$0 sm:$0xff]  ;;  %v825_v51 = vunpack.c.l.bf16 %v3904_v47  ;;  %v3607_v62 = vld [vmem:[%s4615_s8 + $0x2] ss:$0 sm:$0xff] }
  0x23   : > { %v3605_v56 = vld [vmem:[%s4615_s8] ss:$0 sm:$0xff]  ;;  %s4620_s8 = sld [smem:[#allocation10_spill]] }
  0x24   : > { %v868_v7 = vadd.f32 %v3621_v3, %v867_v6  ;;  %1140 = vmatpush.bf16.msra.mxu2 %v3476_v21 }
  0x25   : > { %970 = vmatpush.bf16.msra.mxu0 %v3460_v22  ;;  %v3608_v22 = vld [vmem:[%s4583_s22] ss:$0 sm:$0xff] }
  0x26   : > { %v3819_v8 = vsel %vm869_vm0, %v3621_v3, %v868_v7  ;;  %1055 = vmatpush.bf16.msra.mxu1 %v3468_v23 }
  0x28   : > { %1141 = vmatpush.bf16.msra.mxu2 %v3475_v24 }
  0x29   : > { %971 = vmatpush.bf16.msra.mxu0 %v3459_v25 }
  0x2a   : > { %1056 = vmatpush.bf16.msra.mxu1 %v3467_v26 }
  0x2c   : > { %1142 = vmatpush.bf16.msra.mxu2 %v3474_v27 }
  0x2d   : > { %972 = vmatpush.bf16.msra.mxu0 %v3458_v28 }
  0x2e   : > { %1057 = vmatpush.bf16.msra.mxu1 %v3466_v29 }
  0x30   : > { %1143 = vmatpush.bf16.msra.mxu2 %v3473_v30 }
  0x31   : > { %973 = vmatpush.bf16.msra.mxu0 %v3457_v31 }
  0x32   : > { %1058 = vmatpush.bf16.msra.mxu1 %v3465_v32 }
  0x34   : > { %1144 = vmatpush.bf16.msra.mxu2 %v3472_v33 }
  0x35   : > { %974 = vmatpush.bf16.msra.mxu0 %v3456_v34 }
  0x36   : > { %1059 = vmatpush.bf16.msra.mxu1 %v3464_v35 }
  0x8d   : > { %v863_v9 = vpop.xlane.xlu0 %862 }
  0x8e   : > { %v871_v10 = vmul.f32 %v3819_v8, %v863_v9 }
  0x90   : > { %v3823_v11 = vsub.f32 %v3813_v0, %v871_v10 }
  0x92   : > { %v873_v12 = vmul.f32 %v3823_v11, %v3823_v11 }
  0x94   : > { %874 = vadd.xlane.f32.xlu0 %v873_v12 }
 0x107   : > { %v875_v36 = vpop.xlane.xlu0 %874 }
 0x108   : > { %v876_v37 = vmul.f32 %v875_v36, %v3819_v8 }
 0x10a   : > { %v877_v38 = vadd.f32 1e-05, %v876_v37 }
 0x10c   : > { %3622 = vrsqrt.f32 %v877_v38  ;;  %vm884_vm2 = vweird.f32 %v877_v38 }
 0x112   : > { %v3623_v39 = vpop.eup %3622 }
 0x113   : > { %v879_v40 = vmul.f32 %v3623_v39, %v877_v38  ;;  %vm885_vm1 = vweird.f32 %v3623_v39 }
 0x114   : > { %vm886_vm3 = vmor %vm884_vm2, %vm885_vm1 }
 0x115   : > { %v880_v41 = vmul.f32 %v3623_v39, %v879_v40 }
 0x117   : > { %v881_v42 = vmul.f32 0.5, %v880_v41 }
 0x119   : > { %v882_v43 = vsub.f32 1.5, %v881_v42 }
 0x11b   : > { %v883_v44 = vmul.f32 %v3623_v39, %v882_v43 }
 0x11d   : > { %v887_v46 = vsel %vm886_vm3, %v3623_v39, %v883_v44 }
 0x11e   : > { %v888_v48 = vmul.f32 %v887_v46, %v3823_v11 }
 0x120   : > { %v892_v50 = vmul.f32 %v3603_v45, %v888_v48 }
 0x122   : > { %v896_v52 = vadd.f32 %v3604_v49, %v892_v50 }
 0x124   : > { %v1083_v53 = vpack.c.bf16 %v896_v52, %v896_v52  ;;  %v897_v54 = vadd.f32 %v896_v52, %v825_v51 }
 0x126   : > { %1145 = vmatmul.bf16.vlgmr.msra.gmra.mxu2 %v1083_v53  ;;  %v914_v55 = vpack.c.bf16 %v897_v54, %v897_v54 }
 0x128   : > { %975 = vmatmul.bf16.vlgmr.msra.gmra.mxu0 %v914_v55  ;;  %1060 = vmatmul.bf16.vlgmr.msra.gmra.mxu1 %v914_v55 }
 0x1a5   : > { %v976_v58 = vpop.f32.mrf.mxu0  ;;  %v1061_v59 = vpop.f32.mrf.mxu1 }
 0x1a6   : > { %v977_v60 = vadd.f32 %v3605_v56, %v976_v58  ;;  %v1062_v61 = vadd.f32 %v3606_v57, %v1061_v59 }
 0x1a8   : > { %v980_v63 = vmul.f32 0.17677669, %v977_v60  ;;  %v1065_v1 = vpack.c.bf16 %v1062_v61, %v1062_v61 }
 0x1a9   : > { %v1146_v2 = vpop.f32.mrf.mxu2 }
 0x1aa   : > { %v1216_v3 = vunpack.c.l.b16 %v1065_v1  ;;  %v1147_v4 = vadd.f32 %v3607_v62, %v1146_v2  ;;  %v1159_v5 = vsel %vm1154_vm4, %v1065_v1, 0  ;;  %v981_v6 = vpack.c.bf16 %v980_v63, %v980_v63 }
 0x1ab   : > { %1168 = vmatpush.bf16.xpose.msra.mxu3 %v1159_v5 }
 0x1ac   : > { %v1217_v7 = vpack.c.b16 %v1216_v3, %v1216_v3  ;;  %v1150_v9 = vpack.c.bf16 %v1147_v4, %v1147_v4  ;;  %v1211_v13 = vunpack.c.l.b16 %v981_v6 }
 0x1ad   : > { %v978_v10 = vpop.f32.mrf.mxu0  ;;  %v1063_v11 = vpop.f32.mrf.mxu1 }
 0x1ae   : > { %1284 = vrot.lane.b32.xlu0 %v1217_v7, %s4593_s2  ;;  %1218 = vrot.lane.b32.xlu2 %v1217_v7, %s4595_s29  ;;  %v1192_v12 = vsel %vm1190_vm5, %v1150_v9, 0  ;;  %v1212_v15 = vpack.c.b16 %v1211_v13, %v1211_v13  ;;  %v1252_v36 = vunpack.c.l.b16 %v1150_v9 }
 0x1b0   : > { %v1253_v37 = vpack.c.b16 %v1252_v36, %v1252_v36 }
 0x1b1   : > { %v1148_v14 = vpop.f32.mrf.mxu2 }
 0x1b2   : > { %3078 = vmatmul.msk.bf16.vlgmr.msra.gmra.mxu3 %vm1154_vm4, %v981_v6 }
 0x1b3   : > { %1201 = vmatpush.bf16.msrb.mxu3 %v1192_v12 }
 0x1b6   : > { %1213 = vrot.lane.b32.xlu2 %v1212_v15, %s4595_s29 }
 0x1be   : > { %1282 = vrot.lane.b32.xlu2 %v1212_v15, %s4593_s2 }
 0x1c6   : > { %1345 = vrot.lane.b32.xlu2 %v1212_v15, %s4591_s0 }
 0x208   : > { %v1219_v16 = vpop.permute.xlu2 %1218 }
 0x209   : > { %v1224_v17 = vsel %vm1154_vm4, %v1219_v16, 0 }
 0x20a   : > { %1233 = vmatpush.bf16.xpose.msra.mxu3 %v1224_v17 }
 0x210   : > { %v1214_v18 = vpop.permute.xlu2 %1213 }
 0x218   : > { %v1283_v21 = vpop.permute.xlu2 %1282 }
 0x220   : > { %v1285_v19 = vpop.permute.xlu0 %1284  ;;  %v1346_v48 = vpop.permute.xlu2 %1345 }
 0x221   : > { %v1290_v20 = vsel %vm1154_vm4, %v1285_v19, 0 }
 0x222   : > { %1299 = vmatpush.bf16.xpose.msrb.mxu2 %v1290_v20 }
 0x229   : > { %3082 = vmatmul.msk.bf16.vlgmr.msrb.gmra.mxu2 %vm1154_vm4, %v1283_v21 }
 0x235   : > { %v1170_v23 = vpop.f32.mrf.mxu3 }
 0x236   : > { %v1171_v24 = vadd.f32 %v3608_v22, %v1170_v23 }
 0x238   : > { %v1175_v25 = vsel %vm1174_vm6, %v1171_v24, -inf }
 0x239   : > { %1176 = vmax.xlane.f32.xlu1 %v1175_v25 }
 0x23d   : > { %v1172_v26 = vpop.f32.mrf.mxu3 }
 0x2ac   : > { %v1301_v27 = vpop.f32.mrf.mxu2  ;;  %v1177_v28 = vpop.xlane.xlu1 %1176 }
 0x2ad   : > { %v1302_v29 = vadd.f32 %v3608_v22, %v1301_v27  ;;  %v1178_v30 = vsub.f32 %v1171_v24, %v1177_v28 }
 0x2af   : > { %v1179_v31 = vmul.f32 1.442695, %v1178_v30  ;;  %v1305_v32 = vsel %vm1174_vm6, %v1302_v29, -inf }
 0x2b0   : > { %1306 = vmax.xlane.f32.xlu0 %v1305_v32 }
 0x2b1   : > { %3624 = vpow2.f32 %v1179_v31 }
 0x2b4   : > { %v1303_v33 = vpop.f32.mrf.mxu2 }
 0x2b7   : > { %v3625_v34 = vpop.eup %3624 }
 0x2b8   : > { %v1181_v35 = vsel %vm1174_vm6, %v3625_v34, 0.0 }
 0x2b9   : > { %1182 = vadd.xlane.f32.xlu1 %v1181_v35  ;;  %v3486_v35 = vld [vmem:[%s4616_s1 + $0x30] sm:$0xff] }
 0x2c4   : > { %1254 = vrot.lane.b32.xlu0 %v1253_v37, %s4595_s29 }
 0x2d2   : > { %1347 = vrot.lane.b32.xlu1 %v1217_v7, %s4591_s0 }
 0x323   : > { %v1307_v39 = vpop.xlane.xlu0 %1306 }
 0x324   : > { %v1308_v53 = vsub.f32 %v1302_v29, %v1307_v39 }
 0x326   : > { %v1309_v54 = vmul.f32 1.442695, %v1308_v53  ;;  %v3499_v53 = vld [vmem:[%s4617_s4 + $0x58] sm:$0xff] }
 0x32c   : > { %v1183_v38 = vpop.xlane.xlu1 %1182 }
 0x32d   : > { %3626 = vrcp.f32 %v1183_v38  ;;  %v3484_v38 = vld [vmem:[%s4616_s1 + $0x20] sm:$0xff] }
 0x32e   : > { %3628 = vpow2.f32 %v1309_v54  ;;  %v3498_v54 = vld [vmem:[%s4617_s4 + $0x50] sm:$0xff] }
 0x333   : > { %v3627_v40 = vpop.eup %3626 }
 0x334   : > { %v1185_v41 = vmul.f32 %v3627_v40, %v3625_v34  ;;  %v3629_v58 = vpop.eup %3628  ;;  %v3487_v34 = vld [vmem:[%s4616_s1 + $0x38] sm:$0xff] }
 0x335   : > { %v1311_v60 = vsel %vm1174_vm6, %v3629_v58, 0.0  ;;  %1477 = vmatpush.bf16.msrb.mxu1 %v3487_v34 }
 0x336   : > { %v1255_v42 = vpop.permute.xlu0 %1254  ;;  %v1186_v43 = vpack.c.bf16 %v1185_v41, %v1185_v41 }
 0x337   : > { %v1260_v44 = vsel %vm1190_vm5, %v1255_v42, 0  ;;  %v3483_v42 = vld [vmem:[%s4616_s1 + $0x18] sm:$0xff] }
 0x338   : > { %3079 = vmatmul.msk.bf16.vlgmr.msrb.gmra.mxu3 %vm1174_vm6, %v1186_v43  ;;  %1269 = vmatpush.bf16.msrb.mxu0 %v1260_v44  ;;  %v3482_v43 = vld [vmem:[%s4616_s1 + $0x10] sm:$0xff]  ;;  %v3481_v44 = vld [vmem:[%s4616_s1 + $0x8] sm:$0xff] }
 0x339   : > { %1478 = vmatpush.bf16.msrb.mxu1 %v3486_v35 }
 0x344   : > { %v1348_v45 = vpop.permute.xlu1 %1347 }
 0x345   : > { %v1353_v46 = vsel %vm1154_vm4, %v1348_v45, 0  ;;  %v3480_v45 = vld [vmem:[%s4616_s1] sm:$0xff] }
 0x346   : > { %1362 = vmatpush.bf16.xpose.msrb.mxu3 %v1353_v46  ;;  %v3503_v46 = vld [vmem:[%s4617_s4 + $0x78] sm:$0xff] }
 0x348   : > { %3080 = vmatmul.msk.bf16.vlgmr.msra.gmra.mxu3 %vm1154_vm4, %v1214_v18 }
 0x34e   : > { %1700 = vmatpush.bf16.msra.mxu3 %v3503_v46 }
 0x358   : > { %3084 = vmatmul.msk.bf16.vlgmr.msrb.gmra.mxu3 %vm1154_vm4, %v1346_v48  ;;  %v3502_v48 = vld [vmem:[%s4617_s4 + $0x70] sm:$0xff] }
 0x359   : > { %1701 = vmatpush.bf16.msra.mxu3 %v3502_v48 }
 0x3bb   : > { %v1203_v49 = vpop.f32.mrf.mxu3 }
 0x3bc   : > { %v1207_v50 = vpack.c.bf16 %v1203_v49, %v1203_v49  ;;  %v3501_v49 = vld [vmem:[%s4617_s4 + $0x68] sm:$0xff] }
 0x3bd   : > { %1702 = vmatpush.bf16.msra.mxu3 %v3501_v49 }
 0x3be   : > { %1209 = vst.msk [vmem:[#allocation2] sm:$0xf] %vm1208_vm7, %v1207_v50  ;;  %v3500_v50 = vld [vmem:[%s4617_s4 + $0x60] sm:$0xff] }
 0x3c1   : > { %1703 = vmatpush.bf16.msra.mxu3 %v3500_v50 }
 0x3c3   : > { %v1205_v52 = vpop.f32.mrf.mxu3 }
 0x3c5   : > { %1704 = vmatpush.bf16.msra.mxu3 %v3499_v53 }
 0x3c9   : > { %1705 = vmatpush.bf16.msra.mxu3 %v3498_v54 }
 0x3cb   : > { %v1235_v55 = vpop.f32.mrf.mxu3 }
 0x3cc   : > { %v1236_v56 = vadd.f32 %v3608_v22, %v1235_v55 }
 0x3ce   : > { %v1239_v57 = vsel %vm1174_vm6, %v1236_v56, -inf }
 0x3cf   : > { %1240 = vmax.xlane.f32.xlu2 %v1239_v57 }
 0x3d3   : > { %v1237_v59 = vpop.f32.mrf.mxu3 }
 0x3d7   : > { %1312 = vadd.xlane.f32.xlu2 %v1311_v60 }
 0x3db   : > { %v1364_v61 = vpop.f32.mrf.mxu3 }
 0x3dc   : > { %v1365_v62 = vadd.f32 %v3608_v22, %v1364_v61 }
 0x3de   : > { %v1368_v63 = vsel %vm1174_vm6, %v1365_v62, -inf }
 0x3df   : > { %1369 = vmax.xlane.f32.xlu1 %v1368_v63 }
 0x3e3   : > { %v1366_v1 = vpop.f32.mrf.mxu3 }
 0x442   : > { %v1241_v2 = vpop.xlane.xlu2 %1240 }
 0x443   : > { %v1242_v3 = vsub.f32 %v1236_v56, %v1241_v2 }
 0x445   : > { %v1243_v4 = vmul.f32 1.442695, %v1242_v3  ;;  %v3496_v3 = vld [vmem:[%s4617_s4 + $0x40] sm:$0xff] }
 0x447   : > { %3630 = vpow2.f32 %v1243_v4 }
 0x44a   : > { %v1313_v13 = vpop.xlane.xlu2 %1312 }
 0x44d   : > { %v3631_v5 = vpop.eup %3630 }
 0x44e   : > { %v1245_v6 = vsel %vm1174_vm6, %v3631_v5, 0.0 }
 0x44f   : > { %1246 = vadd.xlane.f32.xlu2 %v1245_v6 }
 0x452   : > { %v1370_v7 = vpop.xlane.xlu1 %1369 }
 0x453   : > { %v1371_v9 = vsub.f32 %v1365_v62, %v1370_v7  ;;  %v3497_v62 = vld [vmem:[%s4617_s4 + $0x48] sm:$0xff] }
 0x454   : > { %1706 = vmatpush.bf16.msra.mxu3 %v3497_v62 }
 0x455   : > { %v1372_v10 = vmul.f32 1.442695, %v1371_v9 }
 0x457   : > { %3632 = vpow2.f32 %v1372_v10 }
 0x458   : > { %3634 = vrcp.f32 %v1313_v13  ;;  %1707 = vmatpush.bf16.msra.mxu3 %v3496_v3 }
 0x45d   : > { %v3633_v11 = vpop.eup %3632 }
 0x45e   : > { %v1374_v12 = vsel %vm1174_vm6, %v3633_v11, 0.0  ;;  %v3635_v15 = vpop.eup %3634 }
 0x45f   : > { %1375 = vadd.xlane.f32.xlu1 %v1374_v12  ;;  %v1315_v17 = vmul.f32 %v3635_v15, %v3629_v58 }
 0x461   : > { %v1316_v22 = vpack.c.bf16 %v1315_v17, %v1315_v17 }
 0x467   : > { %1317 = vrot.lane.b32.xlu2 %v1253_v37, %s4593_s2 }
 0x478   : > { %1380 = vrot.lane.b32.xlu1 %v1253_v37, %s4591_s0  ;;  %v3485_v37 = vld [vmem:[%s4616_s1 + $0x28] sm:$0xff] }
 0x479   : > { %1479 = vmatpush.bf16.msrb.mxu1 %v3485_v37 }
 0x47d   : > { %1480 = vmatpush.bf16.msrb.mxu1 %v3484_v38 }
 0x481   : > { %1481 = vmatpush.bf16.msrb.mxu1 %v3483_v42 }
 0x485   : > { %1482 = vmatpush.bf16.msrb.mxu1 %v3482_v43 }
 0x489   : > { %1483 = vmatpush.bf16.msrb.mxu1 %v3481_v44 }
 0x48d   : > { %1484 = vmatpush.bf16.msrb.mxu1 %v3480_v45 }
 0x4c2   : > { %v1247_v14 = vpop.xlane.xlu2 %1246 }
 0x4c3   : > { %3636 = vrcp.f32 %v1247_v14 }
 0x4c9   : > { %v3637_v16 = vpop.eup %3636 }
 0x4ca   : > { %v1249_v18 = vmul.f32 %v3637_v16, %v3631_v5  ;;  %v1318_v19 = vpop.permute.xlu2 %1317 }
 0x4cb   : > { %v1323_v20 = vsel %vm1190_vm5, %v1318_v19, 0 }
 0x4cc   : > { %1332 = vmatpush.bf16.msra.mxu2 %v1323_v20  ;;  %v1250_v21 = vpack.c.bf16 %v1249_v18, %v1249_v18 }
 0x4ce   : > { %3081 = vmatmul.msk.bf16.vlgmr.msrb.gmra.mxu0 %vm1174_vm6, %v1250_v21 }
 0x4cf   : > { %3083 = vmatmul.msk.bf16.vlgmr.msra.gmra.mxu2 %vm1174_vm6, %v1316_v22 }
 0x4d2   : > { %v1376_v23 = vpop.xlane.xlu1 %1375 }
 0x4d3   : > { %3638 = vrcp.f32 %v1376_v23 }
 0x4d9   : > { %v3639_v24 = vpop.eup %3638 }
 0x4da   : > { %v1378_v25 = vmul.f32 %v3639_v24, %v3633_v11 }
 0x4dc   : > { %v1379_v28 = vpack.c.bf16 %v1378_v25, %v1378_v25 }
 0x4ea   : > { %v1381_v26 = vpop.permute.xlu1 %1380 }
 0x4eb   : > { %v1386_v27 = vsel %vm1190_vm5, %v1381_v26, 0 }
 0x4ec   : > { %1395 = vmatpush.bf16.msra.mxu0 %v1386_v27 }
 0x4ef   : > { %3085 = vmatmul.msk.bf16.vlgmr.msra.gmra.mxu0 %vm1174_vm6, %v1379_v28 }
 0x54b   : > { %v1271_v29 = vpop.f32.mrf.mxu0 }
 0x54c   : > { %v1275_v30 = vpack.c.bf16 %v1271_v29, %v1271_v29 }
 0x54e   : > { %1277 = vrot.lane.b32.xlu0 %v1275_v30, %s4591_s0  ;;  %s3446_s0 = sshll.u32 %s4626_s26, 6 }
 0x54f   : > { %s4005_s1 = scalar_lea.vmem %s4618_s25, %s3446_s0  ;;  %s4010_s13 = scalar_lea.vmem %s4619_s12, %s3446_s0 }
 0x550   : > { %v792_v55 = vld [vmem:[%s4005_s1] sm:$0xff]   ;;  %v794_v6 = vld [vmem:[%s4005_s1 + $0x8] sm:$0xff]   ;;  %v796_v16 = vld [vmem:[%s4005_s1 + $0x10] sm:$0xff]   ;;  %s4621_s0 = smov 96  }
 0x551   : > { %v3553_v56 = vld [vmem:[%s4010_s13] sm:$0xff]   ;;  %v808_v57 = vunpack.c.l.bf16 %v792_v55  ;;  %v809_v58 = vunpack.c.h.bf16 %v792_v55  ;;  %v3584_v7 = vld [vmem:[%s4010_s13 + $0x8] sm:$0xff]   ;;  %v810_v9 = vunpack.c.l.bf16 %v794_v6  ;;  %v811_v10 = vunpack.c.h.bf16 %v794_v6  ;;  %v3585_v17 = vld [vmem:[%s4010_s13 + $0x10] sm:$0xff]  }
 0x552   : > { %v1334_v31 = vpop.f32.mrf.mxu2  ;;  %v3554_v59 = vunpack.c.l.bf16 %v3553_v56  ;;  %v3555_v60 = vunpack.c.h.bf16 %v3553_v56  ;;  %v3558_v11 = vunpack.c.l.bf16 %v3584_v7  ;;  %v3559_v12 = vunpack.c.h.bf16 %v3584_v7  ;;  %v798_v25 = vld [vmem:[%s4005_s1 + $0x18] sm:$0xff]   ;;  %v800_v34 = vld [vmem:[%s4005_s1 + $0x20] sm:$0xff]   ;;  %v802_v43 = vld [vmem:[%s4005_s1 + $0x28] sm:$0xff]  }
 0x553   : > { %v1338_v32 = vpack.c.bf16 %v1334_v31, %v1334_v31  ;;  %v1273_v33 = vpop.f32.mrf.mxu0  ;;  %v812_v18 = vunpack.c.l.bf16 %v796_v16  ;;  %v813_v19 = vunpack.c.h.bf16 %v796_v16  ;;  %v3562_v20 = vunpack.c.l.bf16 %v3585_v17  ;;  %v3586_v26 = vld [vmem:[%s4010_s13 + $0x18] sm:$0xff]   ;;  %v3587_v35 = vld [vmem:[%s4010_s13 + $0x20] sm:$0xff]   ;;  %v3588_v44 = vld [vmem:[%s4010_s13 + $0x28] sm:$0xff]  }
 0x554   : > { %v1522_v1 = vadd.f32 %v3554_v59, %v808_v57  ;;  %v1523_v2 = vadd.f32 %v3555_v60, %v809_v58  ;;  %v1524_v13 = vadd.f32 %v3558_v11, %v810_v9  ;;  %v1525_v14 = vadd.f32 %v3559_v12, %v811_v10  ;;  %v804_v54 = vld [vmem:[%s4005_s1 + $0x30] sm:$0xff]   ;;  %v3509_v12 = vld [vmem:[%s4617_s4 + $0xa8] sm:$0xff] }
 0x555   : > { %v3563_v21 = vunpack.c.h.bf16 %v3585_v17  ;;  %v1526_v22 = vadd.f32 %v3562_v20, %v812_v18  ;;  %v814_v27 = vunpack.c.l.bf16 %v798_v25  ;;  %v815_v28 = vunpack.c.h.bf16 %v798_v25  ;;  %v3589_v55 = vld [vmem:[%s4010_s13 + $0x30] sm:$0xff]   ;;  %v3505_v20 = vld [vmem:[%s4617_s4 + $0x88] sm:$0xff]  ;;  %v3448_v25 = vld [vmem:[%s4005_s1] sm:$0xff] }
 0x556   : > { %1340 = vrot.lane.b32.xlu0 %v1338_v32, %s4593_s2  ;;  %v1639_v4 = vpack.c.bf16 %v1523_v2, %v1522_v1  ;;  %v1640_v15 = vpack.c.bf16 %v1525_v14, %v1524_v13  ;;  %v3566_v29 = vunpack.c.l.bf16 %v3586_v26  ;;  %v3567_v30 = vunpack.c.h.bf16 %v3586_v26  ;;  %v3590_v1 = vld [vmem:[%s4010_s13 + $0x38] sm:$0xff]   ;;  %v3510_v7 = vld [vmem:[%s4617_s4 + $0xb0] sm:$0xff]  ;;  %v3508_v13 = vld [vmem:[%s4617_s4 + $0xa0] sm:$0xff]  ;;  %s4622_s2 = smov 64  }
 0x557   : > { %v1527_v23 = vadd.f32 %v3563_v21, %v813_v19  ;;  %v817_v37 = vunpack.c.h.bf16 %v800_v34  ;;  %v3570_v38 = vunpack.c.l.bf16 %v3587_v35  ;;  %v818_v45 = vunpack.c.l.bf16 %v802_v43  ;;  %v3511_v2 = vld [vmem:[%s4617_s4 + $0xb8] sm:$0xff]  ;;  %v3506_v17 = vld [vmem:[%s4617_s4 + $0x90] sm:$0xff] }
 0x558   : > { %1708 = vmatmul.bf16.vlgmr.msra.gmra.mxu3 %v1639_v4  ;;  %v1528_v31 = vadd.f32 %v3566_v29, %v814_v27  ;;  %v1529_v32 = vadd.f32 %v3567_v30, %v815_v28  ;;  %v819_v46 = vunpack.c.h.bf16 %v802_v43  ;;  %v3574_v48 = vunpack.c.l.bf16 %v3588_v44  ;;  %1883 = vmatpush.bf16.msrb.mxu0 %v3511_v2  ;;  %v3507_v14 = vld [vmem:[%s4617_s4 + $0x98] sm:$0xff] }
 0x559   : > { %v1641_v24 = vpack.c.bf16 %v1527_v23, %v1526_v22  ;;  %v3575_v49 = vunpack.c.h.bf16 %v3588_v44  ;;  %v820_v56 = vunpack.c.l.bf16 %v804_v54  ;;  %v821_v57 = vunpack.c.h.bf16 %v804_v54  ;;  %v4071_v23 = vld [vmem:[%s4570_s9 + $0x1] ss:$0 sm:$0xff] }
 0x55a   : > { %v1336_v36 = vpop.f32.mrf.mxu2  ;;  %v1642_v33 = vpack.c.bf16 %v1529_v32, %v1528_v31  ;;  %v1532_v50 = vadd.f32 %v3574_v48, %v818_v45  ;;  %v3578_v58 = vunpack.c.l.bf16 %v3589_v55  ;;  %v3579_v59 = vunpack.c.h.bf16 %v3589_v55  ;;  %v3450_v45 = vld [vmem:[%s4005_s1 + $0x10] sm:$0xff] }
 0x55b   : > { %v816_v36 = vunpack.c.l.bf16 %v800_v34  ;;  %v3583_v6 = vunpack.c.h.bf16 %v3590_v1 }
 0x55c   : > { %v1534_v60 = vadd.f32 %v3578_v58, %v820_v56  ;;  %1884 = vmatpush.bf16.msrb.mxu0 %v3510_v7  ;;  %v3451_v7 = vld [vmem:[%s4005_s1 + $0x18] sm:$0xff] }
 0x560   : > { %1885 = vmatpush.bf16.msrb.mxu0 %v3509_v12 }
 0x564   : > { %1886 = vmatpush.bf16.msrb.mxu0 %v3508_v13 }
 0x568   : > { %1713 = vmatmul.bf16.gmra.mxu3 %v1640_v15  ;;  %v3609_v15 = vld [vmem:[%s4620_s8] ss:$0 sm:$0xff]  ;;  %1887 = vmatpush.bf16.msrb.mxu0 %v3507_v14  ;;  %s4624_s8 = sshll.u32 %s4626_s26, 3 }
 0x569   : > { %s789_s28 = scalar_lea.vmem %s4585_s24, %s4624_s8 }
 0x56c   : > { %v1397_v39 = vpop.f32.mrf.mxu0  ;;  %1888 = vmatpush.bf16.msrb.mxu0 %v3506_v17 }
 0x56d   : > { %v1401_v40 = vpack.c.bf16 %v1397_v39, %v1397_v39  ;;  %v3571_v39 = vunpack.c.h.bf16 %v3587_v35  ;;  %v3449_v35 = vld [vmem:[%s4005_s1 + $0x8] sm:$0xff] }
 0x56f   : > { %1403 = vrot.lane.b32.xlu2 %v1401_v40, %s4595_s29  ;;  %v1530_v40 = vadd.f32 %v3570_v38, %v816_v36  ;;  %s4623_s29 = smov 32  }
 0x570   : > { %1889 = vmatpush.bf16.msrb.mxu0 %v3505_v20 }
 0x574   : > { %v1399_v41 = vpop.f32.mrf.mxu0 }
 0x575   : > { %v1531_v41 = vadd.f32 %v3571_v39, %v817_v37 }
 0x577   : > { %v1643_v42 = vpack.c.bf16 %v1531_v41, %v1530_v40 }
 0x578   : > { %1718 = vmatmul.bf16.gmra.mxu3 %v1641_v24 }
 0x588   : > { %1723 = vmatmul.bf16.gmra.mxu3 %v1642_v33 }
 0x598   : > { %1728 = vmatmul.bf16.gmra.mxu3 %v1643_v42 }
 0x5c0   : > { %v1278_v52 = vpop.permute.xlu0 %1277 }
 0x5c1   : > { %1281 = vst.msk [vmem:[#allocation2] sm:$0xf] %vm1280_vm8, %v1278_v52  ;;  %v1533_v52 = vadd.f32 %v3575_v49, %v819_v46 }
 0x5c3   : > { %v1644_v53 = vpack.c.bf16 %v1533_v52, %v1532_v50 }
 0x5c5   : > { %1733 = vmatmul.bf16.gmra.mxu3 %v1644_v53 }
 0x5c8   : > { %v1341_v61 = vpop.permute.xlu0 %1340 }
 0x5c9   : > { %1344 = vst.msk [vmem:[#allocation2] sm:$0xf] %vm1343_vm9, %v1341_v61  ;;  %v1404_v63 = vpop.permute.xlu2 %1403  ;;  %v1535_v61 = vadd.f32 %v3579_v59, %v821_v57 }
 0x5ca   : > { %1407 = vst.msk [vmem:[#allocation2] sm:$0xf] %vm1406_vm10, %v1404_v63  ;;  %v806_v63 = vld [vmem:[%s4005_s1 + $0x38] sm:$0xff]  }
 0x5cb   : > { %v1645_v62 = vpack.c.bf16 %v1535_v61, %v1534_v60  ;;  %v822_v3 = vunpack.c.l.bf16 %v806_v63  ;;  %v823_v4 = vunpack.c.h.bf16 %v806_v63 }
 0x5cd   : > { %v1537_v10 = vadd.f32 %v3583_v6, %v823_v4 }
 0x5d1   : > { %v1408_v5 = vld [vmem:[#allocation2] sm:$0xf] }
 0x5d2   : > { %1485 = vmatmul.bf16.vlgmr.msrb.gmra.mxu1 %v1408_v5  ;;  %v3582_v5 = vunpack.c.l.bf16 %v3590_v1 }
 0x5d4   : > { %v1536_v9 = vadd.f32 %v3582_v5, %v822_v3 }
 0x5d5   : > { %1738 = vmatmul.bf16.gmra.mxu3 %v1645_v62 }
 0x5d6   : > { %v1646_v11 = vpack.c.bf16 %v1537_v10, %v1536_v9 }
 0x5db   : > { %v1709_v21 = vpop.f32.mrf.mxu3 }
 0x5dc   : > { %v1710_v24 = vadd.f32 %v4071_v23, %v1709_v21  ;;  %v3452_v21 = vld [vmem:[%s4005_s1 + $0x20] sm:$0xff] }
 0x5de   : > { %v1749_v26 = vpack.c.bf16 %v1710_v24, %v1710_v24 }
 0x5e0   : > { %v1967_v29 = vunpack.c.l.b16 %v1749_v26 }
 0x5e3   : > { %v1711_v27 = vpop.f32.mrf.mxu3 }
 0x5e4   : > { %v1712_v28 = vadd.f32 %v4071_v23, %v1711_v27 }
 0x5e5   : > { %1743 = vmatmul.bf16.gmra.mxu3 %v1646_v11 }
 0x5e6   : > { %v1750_v30 = vpack.c.bf16 %v1712_v28, %v1712_v28 }
 0x5e8   : > { %v1968_v31 = vunpack.c.l.b16 %v1750_v30 }
 0x5ea   : > { %v4079_v32 = vpack.c.b16 %v1968_v31, %v1967_v29 }
 0x5eb   : > { %v1714_v33 = vpop.f32.mrf.mxu3 }
 0x5ec   : > { %v1715_v34 = vadd.f32 %v4071_v23, %v1714_v33 }
 0x5ee   : > { %v1751_v36 = vpack.c.bf16 %v1715_v34, %v1715_v34  ;;  %v3453_v34 = vld [vmem:[%s4005_s1 + $0x28] sm:$0xff] }
 0x5f0   : > { %v1969_v39 = vunpack.c.l.b16 %v1751_v36 }
 0x5f3   : > { %v1716_v37 = vpop.f32.mrf.mxu3 }
 0x5f4   : > { %v1717_v38 = vadd.f32 %v4071_v23, %v1716_v37 }
 0x5f6   : > { %v1752_v40 = vpack.c.bf16 %v1717_v38, %v1717_v38 }
 0x5f8   : > { %v1970_v41 = vunpack.c.l.b16 %v1752_v40 }
 0x5fa   : > { %v4084_v42 = vpack.c.b16 %v1970_v41, %v1969_v39 }
 0x5fb   : > { %v1719_v43 = vpop.f32.mrf.mxu3 }
 0x5fc   : > { %v1720_v44 = vadd.f32 %v4071_v23, %v1719_v43 }
 0x5fe   : > { %v1753_v46 = vpack.c.bf16 %v1720_v44, %v1720_v44 }
 0x600   : > { %v1971_v50 = vunpack.c.l.b16 %v1753_v46 }
 0x603   : > { %v1721_v48 = vpop.f32.mrf.mxu3 }
 0x604   : > { %v1722_v49 = vadd.f32 %v4071_v23, %v1721_v48  ;;  %v3454_v48 = vld [vmem:[%s4005_s1 + $0x30] sm:$0xff] }
 0x606   : > { %v1754_v52 = vpack.c.bf16 %v1722_v49, %v1722_v49 }
 0x608   : > { %v1972_v53 = vunpack.c.l.b16 %v1754_v52 }
 0x60a   : > { %v4089_v54 = vpack.c.b16 %v1972_v53, %v1971_v50  ;;  %v4126_v53 = vld [vmem:[%s4570_s9 + $0x2] ss:$0 sm:$0xff] }
 0x60b   : > { %v1724_v55 = vpop.f32.mrf.mxu3 }
 0x60c   : > { %v1725_v56 = vadd.f32 %v4071_v23, %v1724_v55 }
 0x60e   : > { %v1755_v57 = vpack.c.bf16 %v1725_v56, %v1725_v56 }
 0x610   : > { %v1973_v60 = vunpack.c.l.b16 %v1755_v57 }
 0x613   : > { %v1726_v58 = vpop.f32.mrf.mxu3 }
 0x614   : > { %v1727_v59 = vadd.f32 %v4071_v23, %v1726_v58 }
 0x616   : > { %v1756_v61 = vpack.c.bf16 %v1727_v59, %v1727_v59 }
 0x618   : > { %v1974_v62 = vunpack.c.l.b16 %v1756_v61 }
 0x61a   : > { %v4093_v63 = vpack.c.b16 %v1974_v62, %v1973_v60  ;;  %v3455_v62 = vld [vmem:[%s4005_s1 + $0x38] sm:$0xff] }
 0x61b   : > { %v1729_v1 = vpop.f32.mrf.mxu3 }
 0x61c   : > { %v1730_v3 = vadd.f32 %v4071_v23, %v1729_v1 }
 0x61e   : > { %v1757_v4 = vpack.c.bf16 %v1730_v3, %v1730_v3 }
 0x620   : > { %v1975_v9 = vunpack.c.l.b16 %v1757_v4 }
 0x623   : > { %v1731_v2 = vpop.f32.mrf.mxu3 }
 0x624   : > { %v1732_v5 = vadd.f32 %v4071_v23, %v1731_v2 }
 0x626   : > { %v1758_v10 = vpack.c.bf16 %v1732_v5, %v1732_v5 }
 0x628   : > { %v1976_v11 = vunpack.c.l.b16 %v1758_v10 }
 0x62a   : > { %v4099_v13 = vpack.c.b16 %v1976_v11, %v1975_v9 }
 0x62c   : > { %v2007_v5 = vsel %vm1154_vm4, %v4099_v13, 0 }
 0x648   : > { %v1734_v6 = vpop.f32.mrf.mxu3 }
 0x649   : > { %v1735_v12 = vadd.f32 %v4071_v23, %v1734_v6 }
 0x64b   : > { %v1759_v14 = vpack.c.bf16 %v1735_v12, %v1735_v12 }
 0x64d   : > { %v1977_v17 = vunpack.c.l.b16 %v1759_v14  ;;  %v2004_v14 = vsel %vm1154_vm4, %v4093_v63, 0 }
 0x64f   : > { %v1486_v16 = vpop.f32.mrf.mxu1 }
 0x650   : > { %v1487_v18 = vadd.f32 %v3609_v15, %v1486_v16  ;;  %v1736_v15 = vpop.f32.mrf.mxu3 }
 0x651   : > { %v1737_v16 = vadd.f32 %v4071_v23, %v1736_v15 }
 0x652   : > { %v4062_v19 = vadd.f32 %v1487_v18, %v3813_v0  ;;  %v3504_v0 = vld [vmem:[%s4617_s4 + $0x80] sm:$0xff] }
 0x653   : > { %1890 = vmatpush.bf16.msrb.mxu0 %v3504_v0  ;;  %v1760_v18 = vpack.c.bf16 %v1737_v16, %v1737_v16  ;;  %v2001_v16 = vsel %vm1154_vm4, %v4089_v54, 0 }
 0x654   : > { %1493 = vadd.xlane.f32.xlu0 %v4062_v19 }
 0x655   : > { %v1978_v20 = vunpack.c.l.b16 %v1760_v18  ;;  %v1995_v18 = vsel %vm1154_vm4, %v4079_v32, 0 }
 0x656   : > { %1891 = vmatmul.bf16.vlgmr.msrb.gmra.mxu0 %v3448_v25 }
 0x657   : > { %v1488_v22 = vpop.f32.mrf.mxu1 }
 0x658   : > { %v4103_v22 = vpack.c.b16 %v1978_v20, %v1977_v17  ;;  %v1739_v0 = vpop.f32.mrf.mxu3  ;;  %v1998_v17 = vsel %vm1154_vm4, %v4084_v42, 0 }
 0x659   : > { %v1740_v24 = vadd.f32 %v4071_v23, %v1739_v0  ;;  %v3494_v0 = vld [vmem:[%s4617_s4 + $0x30] sm:$0xff] }
 0x65a   : > { %2119 = vrot.lane.b32.xlu2 %v4103_v22, %s4621_s0  ;;  %v2010_v1 = vsel %vm1154_vm4, %v4103_v22, 0 }
 0x65b   : > { %v1761_v25 = vpack.c.bf16 %v1740_v24, %v1740_v24  ;;  %v3493_v24 = vld [vmem:[%s4617_s4 + $0x28] sm:$0xff] }
 0x65d   : > { %v1979_v28 = vunpack.c.l.b16 %v1761_v25 }
 0x660   : > { %v1741_v26 = vpop.f32.mrf.mxu3 }
 0x661   : > { %v1742_v27 = vadd.f32 %v4071_v23, %v1741_v26  ;;  %v3492_v26 = vld [vmem:[%s4617_s4 + $0x20] sm:$0xff] }
 0x663   : > { %v1762_v29 = vpack.c.bf16 %v1742_v27, %v1742_v27  ;;  %v3491_v27 = vld [vmem:[%s4617_s4 + $0x18] sm:$0xff] }
 0x665   : > { %v1980_v33 = vunpack.c.l.b16 %v1762_v29 }
 0x666   : > { %1896 = vmatmul.bf16.gmra.mxu0 %v3449_v35 }
 0x667   : > { %v1989_v36 = vpack.c.b16 %v1980_v33, %v1979_v28  ;;  %v3489_v33 = vld [vmem:[%s4617_s4 + $0x8] sm:$0xff] }
 0x668   : > { %v1744_v37 = vpop.f32.mrf.mxu3 }
 0x669   : > { %2232 = vrot.lane.b32.xlu2 %v1989_v36, %s4622_s2  ;;  %v1745_v39 = vadd.f32 %v4071_v23, %v1744_v37  ;;  %v2013_v55 = vsel %vm1154_vm4, %v1989_v36, 0 }
 0x66b   : > { %v1763_v40 = vpack.c.bf16 %v1745_v39, %v1745_v39  ;;  %v3488_v39 = vld [vmem:[%s4617_s4] sm:$0xff] }
 0x66d   : > { %v1981_v44 = vunpack.c.l.b16 %v1763_v40 }
 0x670   : > { %v1746_v41 = vpop.f32.mrf.mxu3 }
 0x671   : > { %v1747_v43 = vadd.f32 %v4071_v23, %v1746_v41  ;;  %2230 = vrot.lane.b32.xlu2 %v4103_v22, %s4622_s2 }
 0x676   : > { %1901 = vmatmul.bf16.gmra.mxu0 %v3450_v45  ;;  %v1764_v45 = vpack.c.bf16 %v1747_v43, %v1747_v43 }
 0x678   : > { %v1982_v46 = vunpack.c.l.b16 %v1764_v45 }
 0x67a   : > { %v1990_v49 = vpack.c.b16 %v1982_v46, %v1981_v44 }
 0x67c   : > { %v2016_v52 = vsel %vm1154_vm4, %v1990_v49, 0  ;;  %2123 = vrot.lane.b32.xlu0 %v1990_v49, %s4621_s0 }
 0x67d   : > { %2018 = vmatpush.bf16.xpose.msra.mxu1 %v2016_v52 }
 0x684   : > { %2234 = vrot.lane.b32.xlu0 %v1990_v49, %s4622_s2 }
 0x685   : > { %2019 = vmatpush.bf16.xpose.msra.mxu1 %v2013_v55 }
 0x686   : > { %1906 = vmatmul.bf16.gmra.mxu0 %v3451_v7 }
 0x68c   : > { %2117 = vrot.lane.b32.xlu0 %v4099_v13, %s4621_s0 }
 0x68d   : > { %2020 = vmatpush.bf16.xpose.msra.mxu1 %v2010_v1 }
 0x694   : > { %2115 = vrot.lane.b32.xlu0 %v4093_v63, %s4621_s0 }
 0x695   : > { %2021 = vmatpush.bf16.xpose.msra.mxu1 %v2007_v5 }
 0x696   : > { %1911 = vmatmul.bf16.gmra.mxu0 %v3452_v21  ;;  %v3495_v21 = vld [vmem:[%s4617_s4 + $0x38] sm:$0xff] }
 0x697   : > { %1607 = vmatpush.bf16.msrb.mxu2 %v3495_v21 }
 0x69b   : > { %1608 = vmatpush.bf16.msrb.mxu2 %v3494_v0 }
 0x69d   : > { %2022 = vmatpush.bf16.xpose.msra.mxu1 %v2004_v14 }
 0x69f   : > { %1609 = vmatpush.bf16.msrb.mxu2 %v3493_v24 }
 0x6a3   : > { %1610 = vmatpush.bf16.msrb.mxu2 %v3492_v26 }
 0x6a5   : > { %2023 = vmatpush.bf16.xpose.msra.mxu1 %v2001_v16 }
 0x6a6   : > { %1916 = vmatmul.bf16.gmra.mxu0 %v3453_v34 }
 0x6a7   : > { %1611 = vmatpush.bf16.msrb.mxu2 %v3491_v27 }
 0x6ad   : > { %2024 = vmatpush.bf16.xpose.msra.mxu1 %v1998_v17 }
 0x6b5   : > { %2025 = vmatpush.bf16.xpose.msra.mxu1 %v1995_v18 }
 0x6b6   : > { %1921 = vmatmul.bf16.gmra.mxu0 %v3454_v48 }
 0x6c6   : > { %1926 = vmatmul.bf16.gmra.mxu0 %v3455_v62 }
 0x6c7   : > { %v1494_v30 = vpop.xlane.xlu0 %1493 }
 0x6c8   : > { %v1495_v31 = vmul.f32 %v1494_v30, %v3819_v8  ;;  %v3490_v30 = vld [vmem:[%s4617_s4 + $0x10] sm:$0xff] }
 0x6c9   : > { %1612 = vmatpush.bf16.msrb.mxu2 %v3490_v30 }
 0x6ca   : > { %v4112_v35 = vsub.f32 %v4062_v19, %v1495_v31 }
 0x6cc   : > { %v1497_v38 = vmul.f32 %v4112_v35, %v4112_v35 }
 0x6cd   : > { %1613 = vmatpush.bf16.msrb.mxu2 %v3489_v33 }
 0x6ce   : > { %1498 = vadd.xlane.f32.xlu1 %v1497_v38 }
 0x6d1   : > { %1614 = vmatpush.bf16.msrb.mxu2 %v3488_v39 }
 0x6d3   : > { %v1892_v50 = vpop.f32.mrf.mxu0 }
 0x6d4   : > { %v1893_v23 = vadd.f32 %v4126_v53, %v1892_v50 }
 0x6d6   : > { %v1932_v56 = vpack.c.bf16 %v1893_v23, %v1893_v23 }
 0x6d8   : > { %v2057_v59 = vunpack.c.l.b16 %v1932_v56 }
 0x6db   : > { %v1894_v57 = vpop.f32.mrf.mxu0 }
 0x6dc   : > { %v1895_v58 = vadd.f32 %v4126_v53, %v1894_v57 }
 0x6de   : > { %v1933_v60 = vpack.c.bf16 %v1895_v58, %v1895_v58 }
 0x6e0   : > { %v2058_v61 = vunpack.c.l.b16 %v1933_v60 }
 0x6e2   : > { %v4137_v2 = vpack.c.b16 %v2058_v61, %v2057_v59 }
 0x6e3   : > { %v1897_v3 = vpop.f32.mrf.mxu0 }
 0x6e4   : > { %v1898_v4 = vadd.f32 %v4126_v53, %v1897_v3 }
 0x6e6   : > { %v1934_v6 = vpack.c.bf16 %v1898_v4, %v1898_v4  ;;  %v3612_v4 = vld [vmem:[%s4575_s14] ss:$0 sm:$0xff] }
 0x6e7   : > { %2121 = vrot.lane.b32.xlu1 %v1989_v36, %s4621_s0 }
 0x6e8   : > { %v2059_v10 = vunpack.c.l.b16 %v1934_v6 }
 0x6eb   : > { %v1899_v7 = vpop.f32.mrf.mxu0 }
 0x6ec   : > { %v1900_v9 = vadd.f32 %v4126_v53, %v1899_v7  ;;  %v3613_v7 = vld [vmem:[%s4576_s15] ss:$0 sm:$0xff] }
 0x6ee   : > { %v1935_v11 = vpack.c.bf16 %v1900_v9, %v1900_v9 }
 0x6ef   : > { %2345 = vrot.lane.b32.xlu1 %v1990_v49, %s4623_s29 }
 0x6f0   : > { %v2060_v12 = vunpack.c.l.b16 %v1935_v11 }
 0x6f2   : > { %v4151_v15 = vpack.c.b16 %v2060_v12, %v2059_v10 }
 0x6f3   : > { %v1902_v20 = vpop.f32.mrf.mxu0 }
 0x6f4   : > { %v1903_v29 = vadd.f32 %v4126_v53, %v1902_v20 }
 0x6f6   : > { %v1936_v31 = vpack.c.bf16 %v1903_v29, %v1903_v29 }
 0x6f7   : > { %2343 = vrot.lane.b32.xlu1 %v1989_v36, %s4623_s29 }
 0x6f8   : > { %v2061_v40 = vunpack.c.l.b16 %v1936_v31 }
 0x6ff   : > { %2341 = vrot.lane.b32.xlu1 %v4103_v22, %s4623_s29  ;;  %v1904_v22 = vpop.f32.mrf.mxu0 }
 0x700   : > { %v1905_v34 = vadd.f32 %v4126_v53, %v1904_v22 }
 0x702   : > { %v1937_v41 = vpack.c.bf16 %v1905_v34, %v1905_v34 }
 0x704   : > { %v2062_v45 = vunpack.c.l.b16 %v1937_v41 }
 0x706   : > { %v4199_v49 = vpack.c.b16 %v2062_v45, %v2061_v40 }
 0x707   : > { %2228 = vrot.lane.b32.xlu1 %v4099_v13, %s4622_s2  ;;  %v1907_v25 = vpop.f32.mrf.mxu0 }
 0x708   : > { %v1908_v36 = vadd.f32 %v4126_v53, %v1907_v25 }
 0x70a   : > { %v1938_v43 = vpack.c.bf16 %v1908_v36, %v1908_v36 }
 0x70c   : > { %v2063_v46 = vunpack.c.l.b16 %v1938_v43 }
 0x70f   : > { %2111 = vrot.lane.b32.xlu1 %v4084_v42, %s4621_s0  ;;  %v1909_v28 = vpop.f32.mrf.mxu0 }
 0x710   : > { %v1910_v37 = vadd.f32 %v4126_v53, %v1909_v28 }
 0x712   : > { %v1939_v44 = vpack.c.bf16 %v1910_v37, %v1910_v37 }
 0x714   : > { %v2064_v48 = vunpack.c.l.b16 %v1939_v44 }
 0x716   : > { %v4201_v50 = vpack.c.b16 %v2064_v48, %v2063_v46  ;;  %v2124_v46 = vpop.permute.xlu0 %2123 }
 0x717   : > { %2337 = vrot.lane.b32.xlu1 %v4093_v63, %s4623_s29  ;;  %v4194_v38 = vpop.f32.mrf.mxu0 }
 0x718   : > { %v1913_v37 = vadd.f32 %v4126_v53, %v4194_v38 }
 0x71f   : > { %2224 = vrot.lane.b32.xlu1 %v4089_v54, %s4622_s2  ;;  %v1914_v55 = vpop.f32.mrf.mxu0 }
 0x720   : > { %v1915_v39 = vadd.f32 %v4126_v53, %v1914_v55 }
 0x727   : > { %v1917_v57 = vpop.f32.mrf.mxu0 }
 0x728   : > { %v1918_v26 = vadd.f32 %v4126_v53, %v1917_v57 }
 0x72a   : > { %v1942_v40 = vpack.c.bf16 %v1918_v26, %v1918_v26 }
 0x72f   : > { %v1919_v62 = vpop.f32.mrf.mxu0 }
 0x730   : > { %v1920_v29 = vadd.f32 %v4126_v53, %v1919_v62  ;;  %v2120_v62 = vpop.permute.xlu2 %2119 }
 0x732   : > { %v1943_v41 = vpack.c.bf16 %v1920_v29, %v1920_v29 }
 0x734   : > { %v2068_v57 = vunpack.c.l.b16 %v1943_v41 }
 0x737   : > { %v1922_v11 = vpop.f32.mrf.mxu0 }
 0x738   : > { %v1923_v24 = vadd.f32 %v4126_v53, %v1922_v11 }
 0x73a   : > { %v1944_v30 = vpack.c.bf16 %v1923_v24, %v1923_v24 }
 0x73c   : > { %v2069_v43 = vunpack.c.l.b16 %v1944_v30 }
 0x73f   : > { %v1924_v18 = vpop.f32.mrf.mxu0 }
 0x740   : > { %v1925_v25 = vadd.f32 %v4126_v53, %v1924_v18 }
 0x741   : > { %v1499_v52 = vpop.xlane.xlu1 %1498 }
 0x742   : > { %v1500_v23 = vmul.f32 %v1499_v52, %v3819_v8  ;;  %v1945_v31 = vpack.c.bf16 %v1925_v25, %v1925_v25  ;;  %v1940_v52 = vpack.c.bf16 %v1913_v37, %v1913_v37 }
 0x744   : > { %v1501_v56 = vadd.f32 1e-05, %v1500_v23  ;;  %v2070_v44 = vunpack.c.l.b16 %v1945_v31  ;;  %v1941_v23 = vpack.c.bf16 %v1915_v39, %v1915_v39 }
 0x746   : > { %3640 = vrsqrt.f32 %v1501_v56  ;;  %vm1508_vm12 = vweird.f32 %v1501_v56  ;;  %v2066_v38 = vunpack.c.l.b16 %v1941_v23 }
 0x747   : > { %v1927_v21 = vpop.f32.mrf.mxu0 }
 0x748   : > { %v1928_v0 = vadd.f32 %v4126_v53, %v1927_v21 }
 0x74a   : > { %v1946_v47 = vpack.c.bf16 %v1928_v0, %v1928_v0 }
 0x74c   : > { %v3641_v58 = vpop.eup %3640  ;;  %v2071_v34 = vunpack.c.l.b16 %v1946_v47  ;;  %v4264_v47 = vld [vmem:[%s4584_s23] ss:$0 sm:$0xff] }
 0x74d   : > { %v1503_v59 = vmul.f32 %v3641_v58, %v1501_v56  ;;  %vm1509_vm11 = vweird.f32 %v3641_v58  ;;  %v2067_v56 = vunpack.c.l.b16 %v1942_v40 }
 0x74e   : > { %vm1510_vm13 = vmor %vm1508_vm12, %vm1509_vm11 }
 0x74f   : > { %v1504_v60 = vmul.f32 %v3641_v58, %v1503_v59  ;;  %v1929_v27 = vpop.f32.mrf.mxu0  ;;  %v2065_v59 = vunpack.c.l.b16 %v1940_v52 }
 0x750   : > { %v1930_v33 = vadd.f32 %v4126_v53, %v1929_v27  ;;  %v2235_v53 = vpop.permute.xlu0 %2234 }
 0x751   : > { %v1505_v61 = vmul.f32 0.5, %v1504_v60  ;;  %v4232_v60 = vpack.c.b16 %v2068_v57, %v2067_v56  ;;  %v2261_v55 = vsel %vm1154_vm4, %v2235_v53, 0 }
 0x752   : > { %v1947_v36 = vpack.c.bf16 %v1930_v33, %v1930_v33  ;;  %2263 = vmatpush.bf16.xpose.msrb.mxu3 %v2261_v55 }
 0x753   : > { %v1506_v1 = vsub.f32 1.5, %v1505_v61  ;;  %v4236_v61 = vpack.c.b16 %v2066_v38, %v2065_v59 }
 0x754   : > { %v2072_v45 = vunpack.c.l.b16 %v1947_v36 }
 0x755   : > { %v1507_v3 = vmul.f32 %v3641_v58, %v1506_v1  ;;  %v2233_v1 = vpop.permute.xlu2 %2232 }
 0x756   : > { %v4227_v48 = vpack.c.b16 %v2072_v45, %v2071_v34 }
 0x757   : > { %v1511_v5 = vsel %vm1510_vm13, %v3641_v58, %v1507_v3  ;;  %v4229_v58 = vpack.c.b16 %v2070_v44, %v2069_v43  ;;  %v2258_v3 = vsel %vm1154_vm4, %v2233_v1, 0 }
 0x758   : > { %v1512_v6 = vmul.f32 %v1511_v5, %v4112_v35  ;;  %2089 = vmatpush.bf16.msra.mxu2 %v4227_v48 }
 0x759   : > { %v4211_v9 = vpop.permute.xlu1 %2121 }
 0x75a   : > { %v1516_v10 = vmul.f32 %v3612_v4, %v1512_v6  ;;  %2264 = vmatpush.bf16.xpose.msrb.mxu3 %v2258_v3  ;;  %v2150_v4 = vsel %vm1154_vm4, %v2124_v46, 0 }
 0x75c   : > { %v1520_v12 = vadd.f32 %v3613_v7, %v1516_v10  ;;  %2090 = vmatpush.bf16.msra.mxu2 %v4229_v58  ;;  %v2147_v7 = vsel %vm1154_vm4, %v4211_v9, 0  ;;  %v3614_v9 = vld [vmem:[%s4570_s9] ss:$0 sm:$0xff] }
 0x75d   : > { %v2231_v5 = vpop.permute.xlu2 %2230 }
 0x75e   : > { %v1521_v14 = vadd.f32 %v1520_v12, %v825_v51  ;;  %v2255_v6 = vsel %vm1154_vm4, %v2231_v5, 0  ;;  %v2144_v12 = vsel %vm1154_vm4, %v2120_v62, 0 }
 0x760   : > { %v1554_v16 = vpack.c.bf16 %v1521_v14, %v1521_v14  ;;  %2091 = vmatpush.bf16.msra.mxu2 %v4232_v60  ;;  %v2118_v14 = vpop.permute.xlu0 %2117 }
 0x761   : > { %v2346_v17 = vpop.permute.xlu1 %2345 }
 0x762   : > { %1615 = vmatmul.bf16.vlgmr.msrb.gmra.mxu2 %v1554_v16  ;;  %v2372_v20 = vsel %vm1154_vm4, %v2346_v17, 0  ;;  %2265 = vmatpush.bf16.xpose.msrb.mxu3 %v2255_v6  ;;  %v2141_v16 = vsel %vm1154_vm4, %v2118_v14, 0 }
 0x763   : > { %2374 = vmatpush.bf16.xpose.msra.mxu0 %v2372_v20 }
 0x764   : > { %2092 = vmatpush.bf16.msra.mxu2 %v4236_v61 }
 0x768   : > { %2093 = vmatpush.bf16.msra.mxu2 %v4201_v50  ;;  %v2116_v17 = vpop.permute.xlu0 %2115 }
 0x769   : > { %v2344_v35 = vpop.permute.xlu1 %2343  ;;  %v2138_v18 = vsel %vm1154_vm4, %v2116_v17, 0 }
 0x76a   : > { %v2369_v22 = vsel %vm1154_vm4, %v2344_v35, 0 }
 0x76b   : > { %2375 = vmatpush.bf16.xpose.msra.mxu0 %v2369_v22 }
 0x76c   : > { %2094 = vmatpush.bf16.msra.mxu2 %v4199_v49 }
 0x770   : > { %2095 = vmatpush.bf16.msra.mxu2 %v4151_v15 }
 0x771   : > { %v2342_v51 = vpop.permute.xlu1 %2341 }
 0x772   : > { %v2366_v28 = vsel %vm1154_vm4, %v2342_v51, 0 }
 0x773   : > { %2376 = vmatpush.bf16.xpose.msra.mxu0 %v2366_v28 }
 0x774   : > { %2096 = vmatpush.bf16.msra.mxu2 %v4137_v2 }
 0x778   : > { %2152 = vmatpush.bf16.xpose.msrb.mxu2 %v2150_v4 }
 0x779   : > { %v2229_v10 = vpop.permute.xlu1 %2228 }
 0x77a   : > { %v2252_v11 = vsel %vm1154_vm4, %v2229_v10, 0 }
 0x77b   : > { %2266 = vmatpush.bf16.xpose.msrb.mxu3 %v2252_v11 }
 0x780   : > { %2153 = vmatpush.bf16.xpose.msrb.mxu2 %v2147_v7 }
 0x781   : > { %v2112_v31 = vpop.permute.xlu1 %2111 }
 0x782   : > { %v2132_v34 = vsel %vm1154_vm4, %v2112_v31, 0 }
 0x788   : > { %2154 = vmatpush.bf16.xpose.msrb.mxu2 %v2144_v12 }
 0x790   : > { %2155 = vmatpush.bf16.xpose.msrb.mxu2 %v2141_v16 }
 0x798   : > { %2156 = vmatpush.bf16.xpose.msrb.mxu2 %v2138_v18 }
 0x7e5   : > { %v1616_v20 = vpop.f32.mrf.mxu2 }
 0x7e6   : > { %v1617_v35 = vadd.f32 %v3614_v9, %v1616_v20 }
 0x7e8   : > { %v1620_v21 = vmul.f32 0.17677669, %v1617_v35 }
 0x7ea   : > { %v1621_v22 = vpack.c.bf16 %v1620_v21, %v1620_v21 }
 0x7ec   : > { %v2105_v0 = vunpack.c.l.b16 %v1621_v22  ;;  %3280 = vmatmul.msk.bf16.vlgmr.msra.gmra.mxu1 %vm1154_vm4, %v1621_v22 }
 0x7ed   : > { %v1618_v24 = vpop.f32.mrf.mxu2 }
 0x7ee   : > { %v2106_v25 = vpack.c.b16 %v2105_v0, %v2105_v0 }
 0x7f0   : > { %2107 = vrot.lane.b32.xlu1 %v2106_v25, %s4621_s0 }
 0x7f8   : > { %2220 = vrot.lane.b32.xlu1 %v4079_v32, %s4622_s2 }
 0x800   : > { %2218 = vrot.lane.b32.xlu1 %v2106_v25, %s4622_s2 }
 0x869   : > { %v2027_v51 = vpop.f32.mrf.mxu1 }
 0x86a   : > { %v2028_v26 = vadd.f32 %v4264_v47, %v2027_v51 }
 0x86c   : > { %2031 = vmax.xlane.f32.xlu2 %v2028_v26 }
 0x871   : > { %v2029_v27 = vpop.f32.mrf.mxu1 }
 0x884   : > { %2113 = vrot.lane.b32.xlu2 %v4089_v54, %s4621_s0 }
 0x88c   : > { %2339 = vrot.lane.b32.xlu2 %v4099_v13, %s4623_s29 }
 0x894   : > { %2226 = vrot.lane.b32.xlu2 %v4093_v63, %s4622_s2 }
 0x89c   : > { %2109 = vrot.lane.b32.xlu2 %v4079_v32, %s4621_s0 }
 0x8a4   : > { %2335 = vrot.lane.b32.xlu2 %v4089_v54, %s4623_s29 }
 0x8ac   : > { %2333 = vrot.lane.b32.xlu2 %v4084_v42, %s4623_s29 }
 0x8b4   : > { %2331 = vrot.lane.b32.xlu2 %v4079_v32, %s4623_s29  ;;  %v2338_v32 = vpop.permute.xlu1 %2337 }
 0x8b5   : > { %v2360_v39 = vsel %vm1154_vm4, %v2338_v32, 0 }
 0x8bc   : > { %2329 = vrot.lane.b32.xlu2 %v2106_v25, %s4623_s29  ;;  %v2225_v41 = vpop.permute.xlu1 %2224 }
 0x8bd   : > { %v2246_v44 = vsel %vm1154_vm4, %v2225_v41, 0 }
 0x8c4   : > { %v2108_v1 = vpop.permute.xlu1 %2107 }
 0x8cc   : > { %v2221_v5 = vpop.permute.xlu1 %2220 }
 0x8cd   : > { %v2240_v7 = vsel %vm1154_vm4, %v2221_v5, 0 }
 0x8d4   : > { %v2219_v10 = vpop.permute.xlu1 %2218 }
 0x8df   : > { %v2032_v28 = vpop.xlane.xlu2 %2031 }
 0x8e0   : > { %v2033_v29 = vsub.f32 %v2028_v26, %v2032_v28 }
 0x8e2   : > { %v2034_v13 = vmul.f32 1.442695, %v2033_v29 }
 0x8e4   : > { %3642 = vpow2.f32 %v2034_v13 }
 0x8e7   : > { %v2114_v30 = vpop.permute.xlu2 %2113 }
 0x8e8   : > { %v2135_v63 = vsel %vm1154_vm4, %v2114_v30, 0 }
 0x8e9   : > { %2157 = vmatpush.bf16.xpose.msrb.mxu2 %v2135_v63 }
 0x8ea   : > { %v3643_v33 = vpop.eup %3642 }
 0x8eb   : > { %2036 = vadd.xlane.f32.xlu0 %v3643_v33 }
 0x8ef   : > { %v2340_v54 = vpop.permute.xlu2 %2339 }
 0x8f0   : > { %v2363_v36 = vsel %vm1154_vm4, %v2340_v54, 0 }
 0x8f1   : > { %2158 = vmatpush.bf16.xpose.msrb.mxu2 %v2132_v34  ;;  %2377 = vmatpush.bf16.xpose.msra.mxu0 %v2363_v36 }
 0x8f7   : > { %v2227_v37 = vpop.permute.xlu2 %2226 }
 0x8f8   : > { %v2249_v40 = vsel %vm1154_vm4, %v2227_v37, 0 }
 0x8f9   : > { %2267 = vmatpush.bf16.xpose.msrb.mxu3 %v2249_v40  ;;  %2378 = vmatpush.bf16.xpose.msra.mxu0 %v2360_v39 }
 0x8ff   : > { %2222 = vrot.lane.b32.xlu0 %v4084_v42, %s4622_s2  ;;  %v2110_v43 = vpop.permute.xlu2 %2109 }
 0x900   : > { %v2129_v45 = vsel %vm1154_vm4, %v2110_v43, 0 }
 0x901   : > { %2159 = vmatpush.bf16.xpose.msrb.mxu2 %v2129_v45  ;;  %2268 = vmatpush.bf16.xpose.msrb.mxu3 %v2246_v44 }
 0x907   : > { %v2336_v46 = vpop.permute.xlu2 %2335  ;;  %2189 = vrot.lane.b32.xlu0 %v4227_v48, %s4621_s0 }
 0x908   : > { %v2357_v52 = vsel %vm1154_vm4, %v2336_v46, 0 }
 0x909   : > { %2379 = vmatpush.bf16.xpose.msra.mxu0 %v2357_v52 }
 0x90f   : > { %v2334_v23 = vpop.permute.xlu2 %2333  ;;  %2411 = vrot.lane.b32.xlu0 %v4227_v48, %s4623_s29 }
 0x910   : > { %v2354_v42 = vsel %vm1154_vm4, %v2334_v23, 0 }
 0x911   : > { %2380 = vmatpush.bf16.xpose.msra.mxu0 %v2354_v42 }
 0x917   : > { %v2332_v56 = vpop.permute.xlu2 %2331  ;;  %2181 = vrot.lane.b32.xlu0 %v4201_v50, %s4621_s0 }
 0x918   : > { %v2351_v57 = vsel %vm1154_vm4, %v2332_v56, 0 }
 0x919   : > { %2381 = vmatpush.bf16.xpose.msra.mxu0 %v2351_v57 }
 0x91f   : > { %v2330_v59 = vpop.permute.xlu2 %2329  ;;  %2407 = vrot.lane.b32.xlu0 %v4232_v60, %s4623_s29 }
 0x920   : > { %3283 = vmatmul.msk.bf16.vlgmr.msra.gmra.mxu0 %vm1154_vm4, %v2330_v59 }
 0x927   : > { %2298 = vrot.lane.b32.xlu0 %v4229_v58, %s4622_s2 }
 0x92f   : > { %2177 = vrot.lane.b32.xlu0 %v4151_v15, %s4621_s0 }
 0x937   : > { %2403 = vrot.lane.b32.xlu0 %v4201_v50, %s4623_s29 }
 0x95e   : > { %v2037_v38 = vpop.xlane.xlu0 %2036 }
 0x95f   : > { %3644 = vrcp.f32 %v2037_v38 }
 0x965   : > { %v3645_v53 = vpop.eup %3644 }
 0x966   : > { %v2039_v55 = vmul.f32 %v3645_v53, %v3643_v33 }
 0x968   : > { %v2040_v62 = vpack.c.bf16 %v2039_v55, %v2039_v55 }
 0x96a   : > { %2097 = vmatmul.bf16.vlgmr.msra.gmra.mxu2 %v2040_v62 }
 0x971   : > { %v2223_v3 = vpop.permute.xlu0 %2222 }
 0x972   : > { %v2243_v4 = vsel %vm1154_vm4, %v2223_v3, 0 }
 0x973   : > { %2269 = vmatpush.bf16.xpose.msrb.mxu3 %v2243_v4 }
 0x979   : > { %v2190_v6 = vpop.permute.xlu0 %2189 }
 0x97a   : > { %3281 = vmatmul.msk.bf16.vlgmr.msrb.gmra.mxu2 %vm1154_vm4, %v2108_v1  ;;  %2199 = vmatpush.bf16.msrb.mxu1 %v2190_v6 }
 0x97b   : > { %2270 = vmatpush.bf16.xpose.msrb.mxu3 %v2240_v7 }
 0x981   : > { %v2412_v11 = vpop.permute.xlu0 %2411 }
 0x982   : > { %3282 = vmatmul.msk.bf16.vlgmr.msrb.gmra.mxu3 %vm1154_vm4, %v2219_v10  ;;  %2421 = vmatpush.bf16.msra.mxu2 %v2412_v11  ;;  %v3519_v10 = vld [vmem:[%s4571_s10 + $0x38] sm:$0xff]  ;;  %v3518_v11 = vld [vmem:[%s4571_s10 + $0x30] sm:$0xff] }
 0x99d   : > { %v2383_v12 = vpop.f32.mrf.mxu0 }
 0x99e   : > { %v2384_v14 = vadd.f32 %v4264_v47, %v2383_v12 }
 0x9a0   : > { %2387 = vmax.xlane.f32.xlu1 %v2384_v14 }
 0x9a5   : > { %v2385_v16 = vpop.f32.mrf.mxu0 }
 0x9a6   : > { %v3517_v16 = vld [vmem:[%s4571_s10 + $0x28] sm:$0xff] }
 0x9b9   : > { %2187 = vrot.lane.b32.xlu1 %v4229_v58, %s4621_s0 }
 0x9c1   : > { %2183 = vrot.lane.b32.xlu1 %v4236_v61, %s4621_s0 }
 0x9c9   : > { %2300 = vrot.lane.b32.xlu1 %v4227_v48, %s4622_s2 }
 0x9d1   : > { %2179 = vrot.lane.b32.xlu1 %v4199_v49, %s4621_s0 }
 0x9d9   : > { %2405 = vrot.lane.b32.xlu1 %v4236_v61, %s4623_s29 }
 0x9e1   : > { %2296 = vrot.lane.b32.xlu1 %v4232_v60, %s4622_s2 }
 0x9e9   : > { %2175 = vrot.lane.b32.xlu1 %v4137_v2, %s4621_s0 }
 0x9ed   : > { %v2098_v17 = vpop.f32.mrf.mxu2 }
 0x9ee   : > { %v2102_v18 = vpack.c.bf16 %v2098_v17, %v2098_v17  ;;  %v3516_v17 = vld [vmem:[%s4571_s10 + $0x20] sm:$0xff] }
 0x9f0   : > { %2103 = vst.msk [vmem:[#allocation2] sm:$0xf] %vm1208_vm7, %v2102_v18 }
 0x9f5   : > { %v2100_v9 = vpop.f32.mrf.mxu2 }
 0x9fd   : > { %v2161_v20 = vpop.f32.mrf.mxu2 }
 0x9fe   : > { %v2162_v48 = vadd.f32 %v4264_v47, %v2161_v20 }
 0xa00   : > { %2165 = vmax.xlane.f32.xlu0 %v2162_v48 }
 0xa05   : > { %v2163_v35 = vpop.f32.mrf.mxu2  ;;  %v2272_v21 = vpop.f32.mrf.mxu3 }
 0xa06   : > { %v2273_v22 = vadd.f32 %v4264_v47, %v2272_v21  ;;  %v3515_v21 = vld [vmem:[%s4571_s10 + $0x18] sm:$0xff] }
 0xa08   : > { %2276 = vmax.xlane.f32.xlu2 %v2273_v22 }
 0xa0d   : > { %v2274_v0 = vpop.f32.mrf.mxu3 }
 0xa0e   : > { %v3513_v0 = vld [vmem:[%s4571_s10 + $0x8] sm:$0xff] }
 0xa13   : > { %v2388_v24 = vpop.xlane.xlu1 %2387 }
 0xa14   : > { %v2389_v25 = vsub.f32 %v2384_v14, %v2388_v24  ;;  %2294 = vrot.lane.b32.xlu0 %v4236_v61, %s4622_s2  ;;  %v2182_v61 = vpop.permute.xlu0 %2181  ;;  %v3512_v24 = vld [vmem:[%s4571_s10] sm:$0xff] }
 0xa16   : > { %v2390_v51 = vmul.f32 1.442695, %v2389_v25 }
 0xa18   : > { %3646 = vpow2.f32 %v2390_v51 }
 0xa1c   : > { %2401 = vrot.lane.b32.xlu0 %v4199_v49, %s4623_s29 }
 0xa1e   : > { %v3647_v26 = vpop.eup %3646 }
 0xa1f   : > { %2392 = vadd.xlane.f32.xlu1 %v3647_v26 }
 0xa20   : > { %2185 = vrot.lane.b32.xlu2 %v4232_v60, %s4621_s0  ;;  %v2408_v60 = vpop.permute.xlu0 %2407 }
 0xa28   : > { %2409 = vrot.lane.b32.xlu2 %v4229_v58, %s4623_s29  ;;  %v2299_v58 = vpop.permute.xlu0 %2298 }
 0xa2b   : > { %v2188_v47 = vpop.permute.xlu1 %2187 }
 0xa2c   : > { %2200 = vmatpush.bf16.msrb.mxu1 %v2188_v47 }
 0xa30   : > { %2292 = vrot.lane.b32.xlu2 %v4201_v50, %s4622_s2  ;;  %v2178_v27 = vpop.permute.xlu0 %2177 }
 0xa33   : > { %v2184_v28 = vpop.permute.xlu1 %2183 }
 0xa38   : > { %2399 = vrot.lane.b32.xlu2 %v4151_v15, %s4623_s29  ;;  %2397 = vrot.lane.b32.xlu1 %v4137_v2, %s4623_s29  ;;  %v2404_v29 = vpop.permute.xlu0 %2403 }
 0xa3b   : > { %v2301_v13 = vpop.permute.xlu1 %2300 }
 0xa40   : > { %2290 = vrot.lane.b32.xlu2 %v4199_v49, %s4622_s2 }
 0xa43   : > { %v2180_v63 = vpop.permute.xlu1 %2179 }
 0xa48   : > { %2288 = vrot.lane.b32.xlu2 %v4151_v15, %s4622_s2 }
 0xa4b   : > { %v2406_v49 = vpop.permute.xlu1 %2405 }
 0xa53   : > { %v2297_v37 = vpop.permute.xlu1 %2296 }
 0xa5b   : > { %v2176_v43 = vpop.permute.xlu1 %2175 }
 0xa73   : > { %v2166_v50 = vpop.xlane.xlu0 %2165 }
 0xa74   : > { %v2167_v30 = vsub.f32 %v2162_v48, %v2166_v50  ;;  %v3534_v50 = vld [vmem:[%s4579_s18 + $0x74] sm:$0xf] }
 0xa76   : > { %v2168_v31 = vmul.f32 1.442695, %v2167_v30 }
 0xa78   : > { %3648 = vpow2.f32 %v2168_v31 }
 0xa7b   : > { %v2277_v33 = vpop.xlane.xlu2 %2276 }
 0xa7c   : > { %v2278_v54 = vsub.f32 %v2273_v22, %v2277_v33  ;;  %v3514_v22 = vld [vmem:[%s4571_s10 + $0x10] sm:$0xff] }
 0xa7e   : > { %v3649_v34 = vpop.eup %3648  ;;  %v2279_v36 = vmul.f32 1.442695, %v2278_v54 }
 0xa7f   : > { %2170 = vadd.xlane.f32.xlu2 %v3649_v34 }
 0xa80   : > { %3650 = vpow2.f32 %v2279_v36  ;;  %v3366_v36 = vld [vmem:[%s4579_s18 + $0x60] sm:$0xf] }
 0xa83   : > { %v2186_v32 = vpop.permute.xlu2 %2185 }
 0xa84   : > { %2201 = vmatpush.bf16.msrb.mxu1 %v2186_v32  ;;  %v3532_v32 = vld [vmem:[%s4579_s18 + $0x64] sm:$0xf] }
 0xa86   : > { %v3651_v15 = vpop.eup %3650  ;;  %v2295_v40 = vpop.permute.xlu0 %2294 }
 0xa87   : > { %2281 = vadd.xlane.f32.xlu0 %v3651_v15 }
 0xa88   : > { %2202 = vmatpush.bf16.msrb.mxu1 %v2184_v28 }
 0xa8b   : > { %v2410_v39 = vpop.permute.xlu2 %2409 }
 0xa8c   : > { %2203 = vmatpush.bf16.msrb.mxu1 %v2182_v61  ;;  %2422 = vmatpush.bf16.msra.mxu2 %v2410_v39  ;;  %v3616_v61 = vld [vmem:[%s4572_s11] ss:$0 sm:$0xff] }
 0xa8e   : > { %v2402_v44 = vpop.permute.xlu0 %2401 }
 0xa90   : > { %2204 = vmatpush.bf16.msrb.mxu1 %v2180_v63  ;;  %2423 = vmatpush.bf16.msra.mxu2 %v2408_v60 }
 0xa92   : > { %v2393_v45 = vpop.xlane.xlu1 %2392 }
 0xa93   : > { %v2293_v41 = vpop.permute.xlu2 %2292  ;;  %3652 = vrcp.f32 %v2393_v45  ;;  %v3360_v45 = vld [vmem:[%s4579_s18 + $0x58] sm:$0xf0] }
 0xa94   : > { %2205 = vmatpush.bf16.msrb.mxu1 %v2178_v27  ;;  %2424 = vmatpush.bf16.msra.mxu2 %v2406_v49  ;;  %v3533_v49 = vld [vmem:[%s4579_s18 + $0x64] sm:$0xf0] }
 0xa97   : > { %2286 = vrot.lane.b32.xlu2 %v4137_v2, %s4622_s2 }
 0xa98   : > { %2206 = vmatpush.bf16.msrb.mxu1 %v2176_v43  ;;  %2425 = vmatpush.bf16.msra.mxu2 %v2404_v29  ;;  %v3374_v29 = vld [vmem:[%s4579_s18 + $0x70] sm:$0xf]  ;;  %v3530_v43 = vld [vmem:[%s4579_s18 + $0x54] sm:$0xf] }
 0xa99   : > { %v3653_v52 = vpop.eup %3652 }
 0xa9a   : > { %v2395_v42 = vmul.f32 %v3653_v52, %v3647_v26  ;;  %v3350_v52 = vld [vmem:[%s4579_s18 + $0x40] sm:$0xf] }
 0xa9b   : > { %v2400_v46 = vpop.permute.xlu2 %2399 }
 0xa9c   : > { %2310 = vmatpush.bf16.msra.mxu1 %v2301_v13  ;;  %2426 = vmatpush.bf16.msra.mxu2 %v2402_v44  ;;  %v2396_v57 = vpack.c.bf16 %v2395_v42, %v2395_v42  ;;  %v3535_v13 = vld [vmem:[%s4579_s18 + $0x74] sm:$0xf0]  ;;  %v3528_v42 = vld [vmem:[%s4579_s18 + $0x44] sm:$0xf] }
 0xa9d   : > { %v3375_v30 = vor.u32 %v3535_v13, %v3374_v29 }
 0xaa0   : > { %2311 = vmatpush.bf16.msra.mxu1 %v2299_v58  ;;  %2427 = vmatpush.bf16.msra.mxu2 %v2400_v46  ;;  %v3363_v46 = vor.u32 %v3530_v43, %v3360_v45  ;;  %v3537_v43 = vld [vmem:[%s4581_s20 + $0x8] sm:$0xff]  ;;  %v3544_v45 = vld [vmem:[%s4581_s20 + $0x40] sm:$0xff] }
 0xaa3   : > { %v2291_v23 = vpop.permute.xlu2 %2290 }
 0xaa4   : > { %2312 = vmatpush.bf16.msra.mxu1 %v2297_v37  ;;  %v3368_v37 = vld [vmem:[%s4579_s18 + $0x68] sm:$0xf0] }
 0xaa5   : > { %v3371_v39 = vor.u32 %v3532_v32, %v3368_v37  ;;  %v3618_v37 = vld [vmem:[%s4578_s17] ss:$0 sm:$0xff] }
 0xaa8   : > { %2313 = vmatpush.bf16.msra.mxu1 %v2295_v40  ;;  %v3358_v40 = vld [vmem:[%s4579_s18 + $0x50] sm:$0xf] }
 0xaaa   : > { %v2398_v56 = vpop.permute.xlu1 %2397 }
 0xaab   : > { %2428 = vmatpush.bf16.msra.mxu2 %v2398_v56  ;;  %v2289_v2 = vpop.permute.xlu2 %2288 }
 0xaac   : > { %2314 = vmatpush.bf16.msra.mxu1 %v2293_v41  ;;  %v3531_v41 = vld [vmem:[%s4579_s18 + $0x54] sm:$0xf0] }
 0xaad   : > { %v3359_v44 = vor.u32 %v3531_v41, %v3358_v40 }
 0xaae   : > { %2429 = vmatmul.bf16.vlgmr.msra.gmra.mxu2 %v2396_v57  ;;  %v3352_v57 = vld [vmem:[%s4579_s18 + $0x48] sm:$0xf0] }
 0xaaf   : > { %2656 = vmatpush.bf16.msrb.mxu2 %v3375_v30  ;;  %v3547_v30 = vld [vmem:[%s4581_s20 + $0x58] sm:$0xff] }
 0xab0   : > { %2315 = vmatpush.bf16.msra.mxu1 %v2291_v23  ;;  %v3529_v23 = vld [vmem:[%s4579_s18 + $0x44] sm:$0xf0] }
 0xab1   : > { %v3351_v56 = vor.u32 %v3529_v23, %v3350_v52 }
 0xab4   : > { %2316 = vmatpush.bf16.msra.mxu1 %v2289_v2  ;;  %v3355_v2 = vor.u32 %v3528_v42, %v3352_v57 }
 0xaf2   : > { %v2171_v59 = vpop.xlane.xlu2 %2170 }
 0xaf3   : > { %3654 = vrcp.f32 %v2171_v59  ;;  %v3342_v59 = vld [vmem:[%s4579_s18 + $0x30] sm:$0xf] }
 0xaf9   : > { %v3655_v38 = vpop.eup %3654 }
 0xafa   : > { %v2173_v53 = vmul.f32 %v3655_v38, %v3649_v34  ;;  %v2287_v55 = vpop.permute.xlu2 %2286  ;;  %v2282_v62 = vpop.xlane.xlu0 %2281  ;;  %v3527_v38 = vld [vmem:[%s4579_s18 + $0x34] sm:$0xf0] }
 0xafb   : > { %2317 = vmatpush.bf16.msra.mxu1 %v2287_v55  ;;  %3656 = vrcp.f32 %v2282_v62  ;;  %v3343_v55 = vor.u32 %v3527_v38, %v3342_v59  ;;  %v3344_v62 = vld [vmem:[%s4579_s18 + $0x38] sm:$0xf0] }
 0xafc   : > { %v2174_v1 = vpack.c.bf16 %v2173_v53, %v2173_v53  ;;  %v3526_v53 = vld [vmem:[%s4579_s18 + $0x34] sm:$0xf] }
 0xafe   : > { %2207 = vmatmul.bf16.vlgmr.msrb.gmra.mxu1 %v2174_v1  ;;  %v3347_v1 = vor.u32 %v3526_v53, %v3344_v62 }
 0xaff   : > { %2509 = vmatpush.bf16.msrb.mxu1 %v3519_v10 }
 0xb01   : > { %v3657_v3 = vpop.eup %3656 }
 0xb02   : > { %v2284_v4 = vmul.f32 %v3657_v3, %v3651_v15  ;;  %v3367_v15 = vor.u32 %v3533_v49, %v3366_v36  ;;  %v3334_v3 = vld [vmem:[%s4579_s18 + $0x20] sm:$0xf] }
 0xb03   : > { %2510 = vmatpush.bf16.msrb.mxu1 %v3518_v11  ;;  %v3326_v11 = vld [vmem:[%s4579_s18 + $0x10] sm:$0xf]  ;;  %v3617_v49 = vld [vmem:[%s4577_s16] ss:$0 sm:$0xff] }
 0xb04   : > { %v2285_v5 = vpack.c.bf16 %v2284_v4, %v2284_v4  ;;  %2657 = vmatpush.bf16.msrb.mxu2 %v3367_v15  ;;  %v3525_v4 = vld [vmem:[%s4579_s18 + $0x24] sm:$0xf0] }
 0xb07   : > { %2511 = vmatpush.bf16.msrb.mxu1 %v3517_v16 }
 0xb08   : > { %2658 = vmatpush.bf16.msrb.mxu2 %v3359_v44  ;;  %v3545_v44 = vld [vmem:[%s4581_s20 + $0x48] sm:$0xff] }
 0xb0b   : > { %2512 = vmatpush.bf16.msrb.mxu1 %v3516_v17  ;;  %v3328_v17 = vld [vmem:[%s4579_s18 + $0x18] sm:$0xf0] }
 0xb0c   : > { %2659 = vmatpush.bf16.msrb.mxu2 %v3351_v56 }
 0xb0e   : > { %2318 = vmatmul.bf16.vlgmr.msra.gmra.mxu1 %v2285_v5  ;;  %v3524_v5 = vld [vmem:[%s4579_s18 + $0x24] sm:$0xf] }
 0xb0f   : > { %2513 = vmatpush.bf16.msrb.mxu1 %v3515_v21  ;;  %v3320_v21 = vld [vmem:[%s4579_s18 + $0x8] sm:$0xf0] }
 0xb10   : > { %2660 = vmatpush.bf16.msrb.mxu2 %v3343_v55 }
 0xb13   : > { %2514 = vmatpush.bf16.msrb.mxu1 %v3514_v22 }
 0xb17   : > { %2515 = vmatpush.bf16.msrb.mxu1 %v3513_v0  ;;  %v3543_v0 = vld [vmem:[%s4581_s20 + $0x38] sm:$0xff] }
 0xb18   : > { %2814 = vmatpush.bf16.msrb.mxu0 %v3543_v0 }
 0xb1b   : > { %2516 = vmatpush.bf16.msrb.mxu1 %v3512_v24  ;;  %v3551_v24 = vld [vmem:[%s4581_s20 + $0x78] sm:$0xff] }
 0xb1f   : > { %2827 = vmatpush.bf16.msra.mxu1 %v3551_v24 }
 0xb31   : > { %v2430_v6 = vpop.f32.mrf.mxu2 }
 0xb32   : > { %v2434_v35 = vpack.c.bf16 %v2430_v6, %v2430_v6  ;;  %v3335_v6 = vor.u32 %v3525_v4, %v3334_v3 }
 0xb34   : > { %2661 = vmatpush.bf16.msrb.mxu2 %v3335_v6  ;;  %v3619_v6 = vld [vmem:[%s4582_s21] ss:$0 sm:$0xff] }
 0xb39   : > { %v2432_v7 = vpop.f32.mrf.mxu2 }
 0xb3a   : > { %v3336_v7 = vld [vmem:[%s4579_s18 + $0x28] sm:$0xf0] }
 0xb3b   : > { %v3339_v10 = vor.u32 %v3524_v5, %v3336_v7 }
 0xb7b   : > { %v2208_v12 = vpop.f32.mrf.mxu1 }
 0xb7c   : > { %v2212_v14 = vpack.c.bf16 %v2208_v12, %v2208_v12  ;;  %v3523_v12 = vld [vmem:[%s4579_s18 + $0x14] sm:$0xf0] }
 0xb7d   : > { %v3327_v16 = vor.u32 %v3523_v12, %v3326_v11 }
 0xb7e   : > { %2214 = vrot.lane.b32.xlu0 %v2212_v14, %s4623_s29  ;;  %v3522_v14 = vld [vmem:[%s4579_s18 + $0x14] sm:$0xf] }
 0xb7f   : > { %2662 = vmatpush.bf16.msrb.mxu2 %v3327_v16 }
 0xb83   : > { %v2210_v18 = vpop.f32.mrf.mxu1 }
 0xb84   : > { %v3331_v18 = vor.u32 %v3522_v14, %v3328_v17 }
 0xb8b   : > { %v2319_v9 = vpop.f32.mrf.mxu1 }
 0xb8c   : > { %v2323_v20 = vpack.c.bf16 %v2319_v9, %v2319_v9  ;;  %v3318_v9 = vld [vmem:[%s4579_s18] sm:$0xf] }
 0xb8e   : > { %2325 = vrot.lane.b32.xlu2 %v2323_v20, %s4622_s2  ;;  %v3521_v20 = vld [vmem:[%s4579_s18 + $0x4] sm:$0xf0] }
 0xb93   : > { %v2321_v48 = vpop.f32.mrf.mxu1 }
 0xb94   : > { %v3520_v48 = vld [vmem:[%s4579_s18 + $0x4] sm:$0xf] }
 0xb95   : > { %v3323_v22 = vor.u32 %v3520_v48, %v3320_v21 }
 0xb96   : > { %2436 = vrot.lane.b32.xlu2 %v2434_v35, %s4621_s0  ;;  %v3319_v35 = vor.u32 %v3521_v20, %v3318_v9 }
 0xb98   : > { %2663 = vmatpush.bf16.msrb.mxu2 %v3319_v35 }
 0xbe8   : > { %v2326_v25 = vpop.permute.xlu2 %2325 }
 0xbf0   : > { %v2215_v51 = vpop.permute.xlu0 %2214  ;;  %v2437_v26 = vpop.permute.xlu2 %2436 }
 0xbf1   : > { %2217 = vst.msk [vmem:[#allocation2] sm:$0xf] %vm1280_vm8, %v2215_v51 }
 0xbf2   : > { %2328 = vst.msk [vmem:[#allocation2] sm:$0xf] %vm1343_vm9, %v2326_v25 }
 0xbf3   : > { %2439 = vst.msk [vmem:[#allocation2] sm:$0xf] %vm1406_vm10, %v2437_v26  ;;  %v3542_v26 = vld [vmem:[%s4581_s20 + $0x30] sm:$0xff] }
 0xbf4   : > { %2815 = vmatpush.bf16.msrb.mxu0 %v3542_v26 }
 0xbfa   : > { %v2440_v47 = vld [vmem:[#allocation2] sm:$0xf] }
 0xbfb   : > { %2517 = vmatmul.bf16.vlgmr.msrb.gmra.mxu1 %v2440_v47  ;;  %v3550_v47 = vld [vmem:[%s4581_s20 + $0x70] sm:$0xff] }
 0xbfc   : > { %2828 = vmatpush.bf16.msra.mxu1 %v3550_v47 }
 0xc78   : > { %v2518_v60 = vpop.f32.mrf.mxu1 }
 0xc79   : > { %v2519_v58 = vadd.f32 %v3616_v61, %v2518_v60  ;;  %v3541_v60 = vld [vmem:[%s4581_s20 + $0x28] sm:$0xff] }
 0xc7a   : > { %2816 = vmatpush.bf16.msrb.mxu0 %v3541_v60 }
 0xc7b   : > { %v4385_v27 = vadd.f32 %v2519_v58, %v4062_v19  ;;  %v3376_v19 = vld [vmem:[%s4579_s18 + $0x78] sm:$0xf0]  ;;  %v3540_v58 = vld [vmem:[%s4581_s20 + $0x20] sm:$0xff] }
 0xc7c   : > { %v3379_v63 = vor.u32 %v3534_v50, %v3376_v19  ;;  %v3539_v50 = vld [vmem:[%s4581_s20 + $0x18] sm:$0xff] }
 0xc7d   : > { %2525 = vadd.xlane.f32.xlu1 %v4385_v27 }
 0xc7e   : > { %2669 = vmatpush.bf16.msra.mxu3 %v3379_v63  ;;  %2817 = vmatpush.bf16.msrb.mxu0 %v3540_v58 }
 0xc80   : > { %v2520_v28 = vpop.f32.mrf.mxu1 }
 0xc81   : > { %v3548_v28 = vld [vmem:[%s4581_s20 + $0x60] sm:$0xff] }
 0xc82   : > { %2670 = vmatpush.bf16.msra.mxu3 %v3371_v39  ;;  %2818 = vmatpush.bf16.msrb.mxu0 %v3539_v50 }
 0xc86   : > { %2671 = vmatpush.bf16.msra.mxu3 %v3363_v46  ;;  %v2570_v46 = vld [vmem:[%s4580_s19] sm:$0x3] }
 0xc87   : > { %v2572_v52 = vperm.slane %v2570_v46, 0  ;;  %v2573_v23 = vperm.slane %v2570_v46, 1 }
 0xc8a   : > { %2672 = vmatpush.bf16.msra.mxu3 %v3355_v2 }
 0xc8e   : > { %2673 = vmatpush.bf16.msra.mxu3 %v3347_v1 }
 0xc92   : > { %2674 = vmatpush.bf16.msra.mxu3 %v3339_v10 }
 0xc96   : > { %2675 = vmatpush.bf16.msra.mxu3 %v3331_v18 }
 0xc9a   : > { %2676 = vmatpush.bf16.msra.mxu3 %v3323_v22 }
 0xcf0   : > { %v2526_v31 = vpop.xlane.xlu1 %2525 }
 0xcf1   : > { %v2527_v33 = vmul.f32 %v2526_v31, %v3819_v8  ;;  %v3538_v31 = vld [vmem:[%s4581_s20 + $0x10] sm:$0xff] }
 0xcf2   : > { %2819 = vmatpush.bf16.msrb.mxu0 %v3538_v31 }
 0xcf3   : > { %v4402_v54 = vsub.f32 %v4385_v27, %v2527_v33  ;;  %v3546_v33 = vld [vmem:[%s4581_s20 + $0x50] sm:$0xff] }
 0xcf5   : > { %v2529_v34 = vmul.f32 %v4402_v54, %v4402_v54 }
 0xcf6   : > { %2820 = vmatpush.bf16.msrb.mxu0 %v3537_v43 }
 0xcf7   : > { %2530 = vadd.xlane.f32.xlu0 %v2529_v34 }
 0xd6a   : > { %v2531_v25 = vpop.xlane.xlu0 %2530 }
 0xd6b   : > { %v2532_v51 = vmul.f32 %v2531_v25, %v3819_v8  ;;  %v3549_v8 = vld [vmem:[%s4581_s20 + $0x68] sm:$0xff] }
 0xd6c   : > { %2829 = vmatpush.bf16.msra.mxu1 %v3549_v8 }
 0xd6d   : > { %v2533_v61 = vadd.f32 1e-05, %v2532_v51 }
 0xd6f   : > { %3658 = vrsqrt.f32 %v2533_v61  ;;  %vm2540_vm15 = vweird.f32 %v2533_v61 }
 0xd70   : > { %2830 = vmatpush.bf16.msra.mxu1 %v3548_v28 }
 0xd74   : > { %2831 = vmatpush.bf16.msra.mxu1 %v3547_v30 }
 0xd75   : > { %v3659_v29 = vpop.eup %3658 }
 0xd76   : > { %v2535_v13 = vmul.f32 %v3659_v29, %v2533_v61  ;;  %vm2541_vm14 = vweird.f32 %v3659_v29 }
 0xd77   : > { %vm2542_vm0 = vmor %vm2540_vm15, %vm2541_vm14 }
 0xd78   : > { %v2536_v19 = vmul.f32 %v3659_v29, %v2535_v13  ;;  %2832 = vmatpush.bf16.msra.mxu1 %v3546_v33 }
 0xd7a   : > { %v2537_v63 = vmul.f32 0.5, %v2536_v19 }
 0xd7c   : > { %v2538_v34 = vsub.f32 1.5, %v2537_v63  ;;  %2833 = vmatpush.bf16.msra.mxu1 %v3545_v44 }
 0xd7e   : > { %v2539_v36 = vmul.f32 %v3659_v29, %v2538_v34 }
 0xd80   : > { %v2543_v32 = vsel %vm2542_vm0, %v3659_v29, %v2539_v36  ;;  %2834 = vmatpush.bf16.msra.mxu1 %v3544_v45 }
 0xd81   : > { %v2544_v15 = vmul.f32 %v2543_v32, %v4402_v54  ;;  %v3536_v54 = vld [vmem:[%s4581_s20] sm:$0xff] }
 0xd82   : > { %2821 = vmatpush.bf16.msrb.mxu0 %v3536_v54 }
 0xd83   : > { %v2548_v39 = vmul.f32 %v3617_v49, %v2544_v15 }
 0xd85   : > { %v2552_v40 = vadd.f32 %v3618_v37, %v2548_v39 }
 0xd87   : > { %v2569_v41 = vpack.c.bf16 %v2552_v40, %v2552_v40 }
 0xd89   : > { %2664 = vmatmul.bf16.vlgmr.msrb.gmra.mxu2 %v2569_v41  ;;  %2677 = vmatmul.bf16.vlgmr.msra.gmra.mxu3 %v2569_v41 }
 0xe0c   : > { %v2665_v42 = vpop.f32.mrf.mxu2  ;;  %v2678_v56 = vpop.f32.mrf.mxu3 }
 0xe0d   : > { %v2666_v57 = vadd.f32 %v2665_v42, %v2572_v52  ;;  %v2679_v2 = vadd.f32 %v2678_v56, %v2573_v23 }
 0xe0f   : > { %v2682_v59 = vmax.f32 %v2666_v57, 0.0  ;;  %v2683_v38 = vmax.f32 %v2679_v2, 0.0 }
 0xe11   : > { %v2716_v53 = vpack.c.bf16 %v2682_v59, %v2682_v59  ;;  %v2717_v55 = vpack.c.bf16 %v2683_v38, %v2683_v38 }
 0xe13   : > { %2822 = vmatmul.bf16.vlgmr.msrb.gmra.mxu0 %v2716_v53  ;;  %2835 = vmatmul.bf16.vlgmr.msra.gmra.mxu1 %v2717_v55 }
 0xe14   : > { %v2667_v62 = vpop.f32.mrf.mxu2  ;;  %v2680_v1 = vpop.f32.mrf.mxu3 }
 0xe90   : > { %v2823_v3 = vpop.f32.mrf.mxu0  ;;  %v2836_v4 = vpop.f32.mrf.mxu1 }
 0xe91   : > { %v2837_v5 = vadd.f32 %v2836_v4, %v2823_v3 }
 0xe93   : > { %v2840_v7 = vadd.f32 %v2837_v5, %v4385_v27 }
 0xe95   : > { %v2845_v10 = vadd.f32 %v3619_v6, %v2840_v7 }
 0xe97   : > { %2846 = vst [vmem:[%s789_s28] sm:$0xff] %v2845_v10 }
 0xe98   : > { %v2825_v11 = vpop.f32.mrf.mxu0  ;;  %v2838_v12 = vpop.f32.mrf.mxu1 }
 0xe99 PF: > { %s34_s5 = sadd.s32 1, %s3666_s5  }
 0xe9a   : > { %p31_p4 = scmp.ge.s32.totalorder %s34_s5, 4  }
 0xe9c   :  { %33 = sbr.rel (!%p31_p4) target bundleno = 12 (0xc), region = 163 }

</bundles_post_ra>
